<compile_context>
chip_gen: v5e
topology: v5e:2x2
jax: 0.10.0
libtpu: 0.0.40
codegen_flags: <defaults>
</compile_context>

<pallas_src>
import math

import jax
import jax.numpy as jnp
from jax.experimental import pallas as pl
from jax.experimental.pallas import tpu as pltpu

NUM_COUNTRY = 7            # -> input/output features = num_country + 1 = 8
HIDDEN = 16
NUM_LAYERS = 4
BATCH = 2
SEQ = 8
FEAT = NUM_COUNTRY + 1     # 8


def _rnn_kernel(x_ref, w_ih_ref, w_hh_ref, b_ref, fc_w_ref, fc_b_ref, out_ref):
    """Whole stacked-RNN forward, wavefront-scheduled, in one invocation.

    x_ref:    (batch, seq*hidden)          lane-packed, feature-padded input
    w_ih_ref: (L, hidden, hidden)          W_ih^T per layer (layer 0 zero-padded)
    w_hh_ref: (L, hidden, hidden)          W_hh^T per layer
    b_ref:    (L, 1, hidden)               fused bias (b_ih + b_hh)
    fc_w_ref: (seq*hidden, seq*out)        block-diagonal FC weight (fc_w^T blocks)
    fc_b_ref: (1, seq*out)                 FC bias tiled over time steps
    out_ref:  (batch, seq*out)             lane-packed outputs, written once
    """
    batch = x_ref.shape[0]
    num_layers = b_ref.shape[0]
    hidden = b_ref.shape[-1]
    seq = x_ref.shape[1] // hidden

    # Hidden state per layer as plain register values (single invocation, no scratch).
    h = [jnp.zeros((batch, hidden), jnp.float32) for _ in range(num_layers)]
    top = [None] * seq  # top-layer hidden per time step, consumed by the hoisted FC head

    # Wavefront over diagonals d = t + l.  Cells on one diagonal only read values from the
    # previous diagonal, so they are independent and their dot/tanh chains overlap.
    for d in range(seq + num_layers - 1):
        lo = max(0, d - seq + 1)
        hi = min(d, num_layers - 1)
        new_h = {}
        for l in range(lo, hi + 1):                        # static unroll over active cells
            t = d - l
            if l == 0:
                inp = x_ref[:, t * hidden:(t + 1) * hidden]    # static lane slice
            else:
                inp = h[l - 1]                                  # layer l-1 output at time t
            # Two independent dots (no lane concat on the critical path).
            pre = (jnp.dot(inp, w_ih_ref[l], preferred_element_type=jnp.float32)
                   + jnp.dot(h[l], w_hh_ref[l], preferred_element_type=jnp.float32)
                   + b_ref[l])
            new_h[l] = jnp.tanh(pre)
        for l, v in new_h.items():                          # commit after the whole diagonal
            h[l] = v
        if hi == num_layers - 1:                            # top layer produced time t = d - (L-1)
            top[d - (num_layers - 1)] = h[num_layers - 1]

    # Hoisted FC head: one lane-pack, one block-diagonal dot, one bias add, one store.
    top_all = jnp.concatenate(top, axis=-1)                 # (batch, seq*hidden)
    out = jnp.dot(top_all, fc_w_ref[...], preferred_element_type=jnp.float32) + fc_b_ref[...]
    out_ref[...] = out.astype(out_ref.dtype)


def rnn_model_forward(x, params):
    """x: (batch, seq, num_country+1) -> (batch, seq, num_country+1)."""
    w_ih0, w_ih_rest, w_hh, b_ih, b_hh, fc_w, fc_b = params
    batch, seq, feat = x.shape
    num_layers, hidden = b_ih.shape
    out_feat = fc_w.shape[0]

    # ---- Parameter-side glue (tiny, one-time; no data-path transposes) ----
    # Uniform per-layer weights: pad layer-0 W_ih^T from (feat, hidden) to (hidden, hidden).
    w_ih0_t_pad = jnp.zeros((hidden, hidden), jnp.float32).at[:feat, :].set(w_ih0.T)
    w_ih_t = jnp.concatenate(
        [w_ih0_t_pad[None], jnp.transpose(w_ih_rest, (0, 2, 1))], axis=0)   # (L, h, h)
    w_hh_t = jnp.transpose(w_hh, (0, 2, 1))                                 # (L, h, h)
    b_fused = (b_ih + b_hh).reshape(num_layers, 1, hidden)                  # (L, 1, h)

    # Block-diagonal FC weight so all time steps go through ONE end-of-kernel dot.
    fc_blk = jnp.kron(jnp.eye(seq, dtype=jnp.float32), fc_w.T.astype(jnp.float32))  # (s*h, s*o)
    fc_b_tiled = jnp.tile(fc_b, seq).reshape(1, seq * out_feat)                      # (1, s*o)

    # Lane-packed, feature-padded input: (batch, seq*hidden).
    x_pad = jnp.zeros((batch, seq, hidden), x.dtype).at[:, :, :feat].set(x)
    x_flat = x_pad.reshape(batch, seq * hidden)

    vmem = pl.BlockSpec(memory_space=pltpu.MemorySpace.VMEM)

    out_flat = pl.pallas_call(
        _rnn_kernel,
        out_shape=jax.ShapeDtypeStruct((batch, seq * out_feat), x.dtype),
        in_specs=[vmem] * 6,
        out_specs=vmem,
    )(x_flat, w_ih_t, w_hh_t, b_fused, fc_blk, fc_b_tiled)

    # Row-major-compatible reshape back to (batch, seq, out) — layout-trivial.
    return out_flat.reshape(batch, seq, out_feat)


def init_params(key, num_country=NUM_COUNTRY, hidden=HIDDEN, num_layers=NUM_LAYERS):
    """PyTorch-style init: all RNN and Linear params ~ U(-1/sqrt(hidden), 1/sqrt(hidden))."""
    feat = num_country + 1
    k = 1.0 / math.sqrt(hidden)
    keys = jax.random.split(key, 7)
    u = lambda kk, shape: jax.random.uniform(kk, shape, jnp.float32, -k, k)
    w_ih0 = u(keys[0], (hidden, feat))                       # weight_ih_l0
    w_ih_rest = u(keys[1], (num_layers - 1, hidden, hidden)) # weight_ih_l{1..}
    w_hh = u(keys[2], (num_layers, hidden, hidden))          # weight_hh_l{0..}
    b_ih = u(keys[3], (num_layers, hidden))
    b_hh = u(keys[4], (num_layers, hidden))
    fc_w = u(keys[5], (feat, hidden))
    fc_b = u(keys[6], (feat,))
    return (w_ih0, w_ih_rest, w_hh, b_ih, b_hh, fc_w, fc_b)


def rnn_model_reference(x, params):
    """Pure-JAX reference (mirrors PyTorch nn.RNN(tanh) + Linear) for validation."""
    w_ih0, w_ih_rest, w_hh, b_ih, b_hh, fc_w, fc_b = params
    batch, seq, _ = x.shape
    num_layers, hidden = b_ih.shape
    h = jnp.zeros((num_layers, batch, hidden), jnp.float32)
    outs = []
    for t in range(seq):
        inp = x[:, t, :]
        new_h = []
        for l in range(num_layers):
            w = w_ih0 if l == 0 else w_ih_rest[l - 1]
            h_new = jnp.tanh(inp @ w.T + b_ih[l] + h[l] @ w_hh[l].T + b_hh[l])
            new_h.append(h_new)
            inp = h_new
        h = jnp.stack(new_h)
        outs.append(inp @ fc_w.T + fc_b)
    return jnp.stack(outs, axis=1)


if __name__ == "__main__":
    key = jax.random.PRNGKey(0)
    pkey, xkey = jax.random.split(key)
    params = init_params(pkey)
    x = jax.random.normal(xkey, (BATCH, SEQ, FEAT), jnp.float32)

    fwd = jax.jit(rnn_model_forward)
    out = jax.block_until_ready(fwd(x, params))

    ref = rnn_model_reference(x, params)
    assert out.shape == (BATCH, SEQ, FEAT), out.shape
    assert jnp.allclose(out, ref, atol=1e-4, rtol=1e-4), float(jnp.max(jnp.abs(out - ref)))

    print("KERNEL_OK")
</pallas_src>

<mosaic_0001>
module attributes {stable_mosaic.version = 11 : i64} {
  func.func @_rnn_kernel(%arg0: memref<2x128xf32, #tpu.memory_space<vmem>>, %arg1: memref<4x16x16xf32, #tpu.memory_space<vmem>>, %arg2: memref<4x16x16xf32, #tpu.memory_space<vmem>>, %arg3: memref<4x1x16xf32, #tpu.memory_space<vmem>>, %arg4: memref<128x64xf32, #tpu.memory_space<vmem>>, %arg5: memref<1x64xf32, #tpu.memory_space<vmem>>, %arg6: memref<2x64xf32, #tpu.memory_space<vmem>>) attributes {dimension_semantics = [], scalar_prefetch = 0 : i64, scratch_operands = 0 : i64, tpu.core_type = #tpu.core_type<tc>} {
    %cst = arith.constant 0.000000e+00 : f32
    %0 = vector.broadcast %cst : f32 to vector<2x16xf32>
    %cst_0 = arith.constant 0.000000e+00 : f32
    %1 = vector.broadcast %cst_0 : f32 to vector<2x16xf32>
    %cst_1 = arith.constant 0.000000e+00 : f32
    %2 = vector.broadcast %cst_1 : f32 to vector<2x16xf32>
    %cst_2 = arith.constant 0.000000e+00 : f32
    %3 = vector.broadcast %cst_2 : f32 to vector<2x16xf32>
    %c0 = arith.constant 0 : index
    %c0_3 = arith.constant 0 : index
    %4 = vector.load %arg0[%c0, %c0_3] : memref<2x128xf32, #tpu.memory_space<vmem>>, vector<2x16xf32>
    %c0_4 = arith.constant 0 : index
    %c0_5 = arith.constant 0 : index
    %c0_6 = arith.constant 0 : index
    %5 = vector.load %arg1[%c0_4, %c0_5, %c0_6] : memref<4x16x16xf32, #tpu.memory_space<vmem>>, vector<1x16x16xf32>
    %6 = vector.shape_cast %5 : vector<1x16x16xf32> to vector<16x16xf32>
    %cst_7 = arith.constant dense<0.000000e+00> : vector<2x16xf32>
    %7 = tpu.matmul %4, %6, %cst_7 {dimension_numbers = #tpu.dot_dimension_numbers<[1], [0], [0], [1], [0, 0, 1, 1], [], []>} : vector<2x16xf32>, vector<16x16xf32>, vector<2x16xf32> -> vector<2x16xf32>
    %c0_8 = arith.constant 0 : index
    %c0_9 = arith.constant 0 : index
    %c0_10 = arith.constant 0 : index
    %8 = vector.load %arg2[%c0_8, %c0_9, %c0_10] : memref<4x16x16xf32, #tpu.memory_space<vmem>>, vector<1x16x16xf32>
    %9 = vector.shape_cast %8 : vector<1x16x16xf32> to vector<16x16xf32>
    %cst_11 = arith.constant dense<0.000000e+00> : vector<2x16xf32>
    %10 = tpu.matmul %0, %9, %cst_11 {dimension_numbers = #tpu.dot_dimension_numbers<[1], [0], [0], [1], [0, 0, 1, 1], [], []>} : vector<2x16xf32>, vector<16x16xf32>, vector<2x16xf32> -> vector<2x16xf32>
    %11 = arith.addf %7, %10 : vector<2x16xf32>
    %c0_12 = arith.constant 0 : index
    %c0_13 = arith.constant 0 : index
    %c0_14 = arith.constant 0 : index
    %12 = vector.load %arg3[%c0_12, %c0_13, %c0_14] : memref<4x1x16xf32, #tpu.memory_space<vmem>>, vector<1x1x16xf32>
    %13 = vector.shape_cast %12 : vector<1x1x16xf32> to vector<1x16xf32>
    %14 = vector.broadcast %13 : vector<1x16xf32> to vector<2x16xf32>
    %15 = arith.addf %11, %14 : vector<2x16xf32>
    %16 = math.tanh %15 : vector<2x16xf32>
    %c0_15 = arith.constant 0 : index
    %c16 = arith.constant 16 : index
    %17 = vector.load %arg0[%c0_15, %c16] : memref<2x128xf32, #tpu.memory_space<vmem>>, vector<2x16xf32>
    %c0_16 = arith.constant 0 : index
    %c0_17 = arith.constant 0 : index
    %c0_18 = arith.constant 0 : index
    %18 = vector.load %arg1[%c0_16, %c0_17, %c0_18] : memref<4x16x16xf32, #tpu.memory_space<vmem>>, vector<1x16x16xf32>
    %19 = vector.shape_cast %18 : vector<1x16x16xf32> to vector<16x16xf32>
    %cst_19 = arith.constant dense<0.000000e+00> : vector<2x16xf32>
    %20 = tpu.matmul %17, %19, %cst_19 {dimension_numbers = #tpu.dot_dimension_numbers<[1], [0], [0], [1], [0, 0, 1, 1], [], []>} : vector<2x16xf32>, vector<16x16xf32>, vector<2x16xf32> -> vector<2x16xf32>
    %c0_20 = arith.constant 0 : index
    %c0_21 = arith.constant 0 : index
    %c0_22 = arith.constant 0 : index
    %21 = vector.load %arg2[%c0_20, %c0_21, %c0_22] : memref<4x16x16xf32, #tpu.memory_space<vmem>>, vector<1x16x16xf32>
    %22 = vector.shape_cast %21 : vector<1x16x16xf32> to vector<16x16xf32>
    %cst_23 = arith.constant dense<0.000000e+00> : vector<2x16xf32>
    %23 = tpu.matmul %16, %22, %cst_23 {dimension_numbers = #tpu.dot_dimension_numbers<[1], [0], [0], [1], [0, 0, 1, 1], [], []>} : vector<2x16xf32>, vector<16x16xf32>, vector<2x16xf32> -> vector<2x16xf32>
    %24 = arith.addf %20, %23 : vector<2x16xf32>
    %c0_24 = arith.constant 0 : index
    %c0_25 = arith.constant 0 : index
    %c0_26 = arith.constant 0 : index
    %25 = vector.load %arg3[%c0_24, %c0_25, %c0_26] : memref<4x1x16xf32, #tpu.memory_space<vmem>>, vector<1x1x16xf32>
    %26 = vector.shape_cast %25 : vector<1x1x16xf32> to vector<1x16xf32>
    %27 = vector.broadcast %26 : vector<1x16xf32> to vector<2x16xf32>
    %28 = arith.addf %24, %27 : vector<2x16xf32>
    %29 = math.tanh %28 : vector<2x16xf32>
    %c1 = arith.constant 1 : index
    %c0_27 = arith.constant 0 : index
    %c0_28 = arith.constant 0 : index
    %30 = vector.load %arg1[%c1, %c0_27, %c0_28] : memref<4x16x16xf32, #tpu.memory_space<vmem>>, vector<1x16x16xf32>
    %31 = vector.shape_cast %30 : vector<1x16x16xf32> to vector<16x16xf32>
    %cst_29 = arith.constant dense<0.000000e+00> : vector<2x16xf32>
    %32 = tpu.matmul %16, %31, %cst_29 {dimension_numbers = #tpu.dot_dimension_numbers<[1], [0], [0], [1], [0, 0, 1, 1], [], []>} : vector<2x16xf32>, vector<16x16xf32>, vector<2x16xf32> -> vector<2x16xf32>
    %c1_30 = arith.constant 1 : index
    %c0_31 = arith.constant 0 : index
    %c0_32 = arith.constant 0 : index
    %33 = vector.load %arg2[%c1_30, %c0_31, %c0_32] : memref<4x16x16xf32, #tpu.memory_space<vmem>>, vector<1x16x16xf32>
    %34 = vector.shape_cast %33 : vector<1x16x16xf32> to vector<16x16xf32>
    %cst_33 = arith.constant dense<0.000000e+00> : vector<2x16xf32>
    %35 = tpu.matmul %1, %34, %cst_33 {dimension_numbers = #tpu.dot_dimension_numbers<[1], [0], [0], [1], [0, 0, 1, 1], [], []>} : vector<2x16xf32>, vector<16x16xf32>, vector<2x16xf32> -> vector<2x16xf32>
    %36 = arith.addf %32, %35 : vector<2x16xf32>
    %c1_34 = arith.constant 1 : index
    %c0_35 = arith.constant 0 : index
    %c0_36 = arith.constant 0 : index
    %37 = vector.load %arg3[%c1_34, %c0_35, %c0_36] : memref<4x1x16xf32, #tpu.memory_space<vmem>>, vector<1x1x16xf32>
    %38 = vector.shape_cast %37 : vector<1x1x16xf32> to vector<1x16xf32>
    %39 = vector.broadcast %38 : vector<1x16xf32> to vector<2x16xf32>
    %40 = arith.addf %36, %39 : vector<2x16xf32>
    %41 = math.tanh %40 : vector<2x16xf32>
    %c0_37 = arith.constant 0 : index
    %c32 = arith.constant 32 : index
    %42 = vector.load %arg0[%c0_37, %c32] : memref<2x128xf32, #tpu.memory_space<vmem>>, vector<2x16xf32>
    %c0_38 = arith.constant 0 : index
    %c0_39 = arith.constant 0 : index
    %c0_40 = arith.constant 0 : index
    %43 = vector.load %arg1[%c0_38, %c0_39, %c0_40] : memref<4x16x16xf32, #tpu.memory_space<vmem>>, vector<1x16x16xf32>
    %44 = vector.shape_cast %43 : vector<1x16x16xf32> to vector<16x16xf32>
    %cst_41 = arith.constant dense<0.000000e+00> : vector<2x16xf32>
    %45 = tpu.matmul %42, %44, %cst_41 {dimension_numbers = #tpu.dot_dimension_numbers<[1], [0], [0], [1], [0, 0, 1, 1], [], []>} : vector<2x16xf32>, vector<16x16xf32>, vector<2x16xf32> -> vector<2x16xf32>
    %c0_42 = arith.constant 0 : index
    %c0_43 = arith.constant 0 : index
    %c0_44 = arith.constant 0 : index
    %46 = vector.load %arg2[%c0_42, %c0_43, %c0_44] : memref<4x16x16xf32, #tpu.memory_space<vmem>>, vector<1x16x16xf32>
    %47 = vector.shape_cast %46 : vector<1x16x16xf32> to vector<16x16xf32>
    %cst_45 = arith.constant dense<0.000000e+00> : vector<2x16xf32>
    %48 = tpu.matmul %29, %47, %cst_45 {dimension_numbers = #tpu.dot_dimension_numbers<[1], [0], [0], [1], [0, 0, 1, 1], [], []>} : vector<2x16xf32>, vector<16x16xf32>, vector<2x16xf32> -> vector<2x16xf32>
    %49 = arith.addf %45, %48 : vector<2x16xf32>
    %c0_46 = arith.constant 0 : index
    %c0_47 = arith.constant 0 : index
    %c0_48 = arith.constant 0 : index
    %50 = vector.load %arg3[%c0_46, %c0_47, %c0_48] : memref<4x1x16xf32, #tpu.memory_space<vmem>>, vector<1x1x16xf32>
    %51 = vector.shape_cast %50 : vector<1x1x16xf32> to vector<1x16xf32>
    %52 = vector.broadcast %51 : vector<1x16xf32> to vector<2x16xf32>
    %53 = arith.addf %49, %52 : vector<2x16xf32>
    %54 = math.tanh %53 : vector<2x16xf32>
    %c1_49 = arith.constant 1 : index
    %c0_50 = arith.constant 0 : index
    %c0_51 = arith.constant 0 : index
    %55 = vector.load %arg1[%c1_49, %c0_50, %c0_51] : memref<4x16x16xf32, #tpu.memory_space<vmem>>, vector<1x16x16xf32>
    %56 = vector.shape_cast %55 : vector<1x16x16xf32> to vector<16x16xf32>
    %cst_52 = arith.constant dense<0.000000e+00> : vector<2x16xf32>
    %57 = tpu.matmul %29, %56, %cst_52 {dimension_numbers = #tpu.dot_dimension_numbers<[1], [0], [0], [1], [0, 0, 1, 1], [], []>} : vector<2x16xf32>, vector<16x16xf32>, vector<2x16xf32> -> vector<2x16xf32>
    %c1_53 = arith.constant 1 : index
    %c0_54 = arith.constant 0 : index
    %c0_55 = arith.constant 0 : index
    %58 = vector.load %arg2[%c1_53, %c0_54, %c0_55] : memref<4x16x16xf32, #tpu.memory_space<vmem>>, vector<1x16x16xf32>
    %59 = vector.shape_cast %58 : vector<1x16x16xf32> to vector<16x16xf32>
    %cst_56 = arith.constant dense<0.000000e+00> : vector<2x16xf32>
    %60 = tpu.matmul %41, %59, %cst_56 {dimension_numbers = #tpu.dot_dimension_numbers<[1], [0], [0], [1], [0, 0, 1, 1], [], []>} : vector<2x16xf32>, vector<16x16xf32>, vector<2x16xf32> -> vector<2x16xf32>
    %61 = arith.addf %57, %60 : vector<2x16xf32>
    %c1_57 = arith.constant 1 : index
    %c0_58 = arith.constant 0 : index
    %c0_59 = arith.constant 0 : index
    %62 = vector.load %arg3[%c1_57, %c0_58, %c0_59] : memref<4x1x16xf32, #tpu.memory_space<vmem>>, vector<1x1x16xf32>
    %63 = vector.shape_cast %62 : vector<1x1x16xf32> to vector<1x16xf32>
    %64 = vector.broadcast %63 : vector<1x16xf32> to vector<2x16xf32>
    %65 = arith.addf %61, %64 : vector<2x16xf32>
    %66 = math.tanh %65 : vector<2x16xf32>
    %c2 = arith.constant 2 : index
    %c0_60 = arith.constant 0 : index
    %c0_61 = arith.constant 0 : index
    %67 = vector.load %arg1[%c2, %c0_60, %c0_61] : memref<4x16x16xf32, #tpu.memory_space<vmem>>, vector<1x16x16xf32>
    %68 = vector.shape_cast %67 : vector<1x16x16xf32> to vector<16x16xf32>
    %cst_62 = arith.constant dense<0.000000e+00> : vector<2x16xf32>
    %69 = tpu.matmul %41, %68, %cst_62 {dimension_numbers = #tpu.dot_dimension_numbers<[1], [0], [0], [1], [0, 0, 1, 1], [], []>} : vector<2x16xf32>, vector<16x16xf32>, vector<2x16xf32> -> vector<2x16xf32>
    %c2_63 = arith.constant 2 : index
    %c0_64 = arith.constant 0 : index
    %c0_65 = arith.constant 0 : index
    %70 = vector.load %arg2[%c2_63, %c0_64, %c0_65] : memref<4x16x16xf32, #tpu.memory_space<vmem>>, vector<1x16x16xf32>
    %71 = vector.shape_cast %70 : vector<1x16x16xf32> to vector<16x16xf32>
    %cst_66 = arith.constant dense<0.000000e+00> : vector<2x16xf32>
    %72 = tpu.matmul %2, %71, %cst_66 {dimension_numbers = #tpu.dot_dimension_numbers<[1], [0], [0], [1], [0, 0, 1, 1], [], []>} : vector<2x16xf32>, vector<16x16xf32>, vector<2x16xf32> -> vector<2x16xf32>
    %73 = arith.addf %69, %72 : vector<2x16xf32>
    %c2_67 = arith.constant 2 : index
    %c0_68 = arith.constant 0 : index
    %c0_69 = arith.constant 0 : index
    %74 = vector.load %arg3[%c2_67, %c0_68, %c0_69] : memref<4x1x16xf32, #tpu.memory_space<vmem>>, vector<1x1x16xf32>
    %75 = vector.shape_cast %74 : vector<1x1x16xf32> to vector<1x16xf32>
    %76 = vector.broadcast %75 : vector<1x16xf32> to vector<2x16xf32>
    %77 = arith.addf %73, %76 : vector<2x16xf32>
    %78 = math.tanh %77 : vector<2x16xf32>
    %c0_70 = arith.constant 0 : index
    %c48 = arith.constant 48 : index
    %79 = vector.load %arg0[%c0_70, %c48] : memref<2x128xf32, #tpu.memory_space<vmem>>, vector<2x16xf32>
    %c0_71 = arith.constant 0 : index
    %c0_72 = arith.constant 0 : index
    %c0_73 = arith.constant 0 : index
    %80 = vector.load %arg1[%c0_71, %c0_72, %c0_73] : memref<4x16x16xf32, #tpu.memory_space<vmem>>, vector<1x16x16xf32>
    %81 = vector.shape_cast %80 : vector<1x16x16xf32> to vector<16x16xf32>
    %cst_74 = arith.constant dense<0.000000e+00> : vector<2x16xf32>
    %82 = tpu.matmul %79, %81, %cst_74 {dimension_numbers = #tpu.dot_dimension_numbers<[1], [0], [0], [1], [0, 0, 1, 1], [], []>} : vector<2x16xf32>, vector<16x16xf32>, vector<2x16xf32> -> vector<2x16xf32>
    %c0_75 = arith.constant 0 : index
    %c0_76 = arith.constant 0 : index
    %c0_77 = arith.constant 0 : index
    %83 = vector.load %arg2[%c0_75, %c0_76, %c0_77] : memref<4x16x16xf32, #tpu.memory_space<vmem>>, vector<1x16x16xf32>
    %84 = vector.shape_cast %83 : vector<1x16x16xf32> to vector<16x16xf32>
    %cst_78 = arith.constant dense<0.000000e+00> : vector<2x16xf32>
    %85 = tpu.matmul %54, %84, %cst_78 {dimension_numbers = #tpu.dot_dimension_numbers<[1], [0], [0], [1], [0, 0, 1, 1], [], []>} : vector<2x16xf32>, vector<16x16xf32>, vector<2x16xf32> -> vector<2x16xf32>
    %86 = arith.addf %82, %85 : vector<2x16xf32>
    %c0_79 = arith.constant 0 : index
    %c0_80 = arith.constant 0 : index
    %c0_81 = arith.constant 0 : index
    %87 = vector.load %arg3[%c0_79, %c0_80, %c0_81] : memref<4x1x16xf32, #tpu.memory_space<vmem>>, vector<1x1x16xf32>
    %88 = vector.shape_cast %87 : vector<1x1x16xf32> to vector<1x16xf32>
    %89 = vector.broadcast %88 : vector<1x16xf32> to vector<2x16xf32>
    %90 = arith.addf %86, %89 : vector<2x16xf32>
    %91 = math.tanh %90 : vector<2x16xf32>
    %c1_82 = arith.constant 1 : index
    %c0_83 = arith.constant 0 : index
    %c0_84 = arith.constant 0 : index
    %92 = vector.load %arg1[%c1_82, %c0_83, %c0_84] : memref<4x16x16xf32, #tpu.memory_space<vmem>>, vector<1x16x16xf32>
    %93 = vector.shape_cast %92 : vector<1x16x16xf32> to vector<16x16xf32>
    %cst_85 = arith.constant dense<0.000000e+00> : vector<2x16xf32>
    %94 = tpu.matmul %54, %93, %cst_85 {dimension_numbers = #tpu.dot_dimension_numbers<[1], [0], [0], [1], [0, 0, 1, 1], [], []>} : vector<2x16xf32>, vector<16x16xf32>, vector<2x16xf32> -> vector<2x16xf32>
    %c1_86 = arith.constant 1 : index
    %c0_87 = arith.constant 0 : index
    %c0_88 = arith.constant 0 : index
    %95 = vector.load %arg2[%c1_86, %c0_87, %c0_88] : memref<4x16x16xf32, #tpu.memory_space<vmem>>, vector<1x16x16xf32>
    %96 = vector.shape_cast %95 : vector<1x16x16xf32> to vector<16x16xf32>
    %cst_89 = arith.constant dense<0.000000e+00> : vector<2x16xf32>
    %97 = tpu.matmul %66, %96, %cst_89 {dimension_numbers = #tpu.dot_dimension_numbers<[1], [0], [0], [1], [0, 0, 1, 1], [], []>} : vector<2x16xf32>, vector<16x16xf32>, vector<2x16xf32> -> vector<2x16xf32>
    %98 = arith.addf %94, %97 : vector<2x16xf32>
    %c1_90 = arith.constant 1 : index
    %c0_91 = arith.constant 0 : index
    %c0_92 = arith.constant 0 : index
    %99 = vector.load %arg3[%c1_90, %c0_91, %c0_92] : memref<4x1x16xf32, #tpu.memory_space<vmem>>, vector<1x1x16xf32>
    %100 = vector.shape_cast %99 : vector<1x1x16xf32> to vector<1x16xf32>
    %101 = vector.broadcast %100 : vector<1x16xf32> to vector<2x16xf32>
    %102 = arith.addf %98, %101 : vector<2x16xf32>
    %103 = math.tanh %102 : vector<2x16xf32>
    %c2_93 = arith.constant 2 : index
    %c0_94 = arith.constant 0 : index
    %c0_95 = arith.constant 0 : index
    %104 = vector.load %arg1[%c2_93, %c0_94, %c0_95] : memref<4x16x16xf32, #tpu.memory_space<vmem>>, vector<1x16x16xf32>
    %105 = vector.shape_cast %104 : vector<1x16x16xf32> to vector<16x16xf32>
    %cst_96 = arith.constant dense<0.000000e+00> : vector<2x16xf32>
    %106 = tpu.matmul %66, %105, %cst_96 {dimension_numbers = #tpu.dot_dimension_numbers<[1], [0], [0], [1], [0, 0, 1, 1], [], []>} : vector<2x16xf32>, vector<16x16xf32>, vector<2x16xf32> -> vector<2x16xf32>
    %c2_97 = arith.constant 2 : index
    %c0_98 = arith.constant 0 : index
    %c0_99 = arith.constant 0 : index
    %107 = vector.load %arg2[%c2_97, %c0_98, %c0_99] : memref<4x16x16xf32, #tpu.memory_space<vmem>>, vector<1x16x16xf32>
    %108 = vector.shape_cast %107 : vector<1x16x16xf32> to vector<16x16xf32>
    %cst_100 = arith.constant dense<0.000000e+00> : vector<2x16xf32>
    %109 = tpu.matmul %78, %108, %cst_100 {dimension_numbers = #tpu.dot_dimension_numbers<[1], [0], [0], [1], [0, 0, 1, 1], [], []>} : vector<2x16xf32>, vector<16x16xf32>, vector<2x16xf32> -> vector<2x16xf32>
    %110 = arith.addf %106, %109 : vector<2x16xf32>
    %c2_101 = arith.constant 2 : index
    %c0_102 = arith.constant 0 : index
    %c0_103 = arith.constant 0 : index
    %111 = vector.load %arg3[%c2_101, %c0_102, %c0_103] : memref<4x1x16xf32, #tpu.memory_space<vmem>>, vector<1x1x16xf32>
    %112 = vector.shape_cast %111 : vector<1x1x16xf32> to vector<1x16xf32>
    %113 = vector.broadcast %112 : vector<1x16xf32> to vector<2x16xf32>
    %114 = arith.addf %110, %113 : vector<2x16xf32>
    %115 = math.tanh %114 : vector<2x16xf32>
    %c3 = arith.constant 3 : index
    %c0_104 = arith.constant 0 : index
    %c0_105 = arith.constant 0 : index
    %116 = vector.load %arg1[%c3, %c0_104, %c0_105] : memref<4x16x16xf32, #tpu.memory_space<vmem>>, vector<1x16x16xf32>
    %117 = vector.shape_cast %116 : vector<1x16x16xf32> to vector<16x16xf32>
    %cst_106 = arith.constant dense<0.000000e+00> : vector<2x16xf32>
    %118 = tpu.matmul %78, %117, %cst_106 {dimension_numbers = #tpu.dot_dimension_numbers<[1], [0], [0], [1], [0, 0, 1, 1], [], []>} : vector<2x16xf32>, vector<16x16xf32>, vector<2x16xf32> -> vector<2x16xf32>
    %c3_107 = arith.constant 3 : index
    %c0_108 = arith.constant 0 : index
    %c0_109 = arith.constant 0 : index
    %119 = vector.load %arg2[%c3_107, %c0_108, %c0_109] : memref<4x16x16xf32, #tpu.memory_space<vmem>>, vector<1x16x16xf32>
    %120 = vector.shape_cast %119 : vector<1x16x16xf32> to vector<16x16xf32>
    %cst_110 = arith.constant dense<0.000000e+00> : vector<2x16xf32>
    %121 = tpu.matmul %3, %120, %cst_110 {dimension_numbers = #tpu.dot_dimension_numbers<[1], [0], [0], [1], [0, 0, 1, 1], [], []>} : vector<2x16xf32>, vector<16x16xf32>, vector<2x16xf32> -> vector<2x16xf32>
    %122 = arith.addf %118, %121 : vector<2x16xf32>
    %c3_111 = arith.constant 3 : index
    %c0_112 = arith.constant 0 : index
    %c0_113 = arith.constant 0 : index
    %123 = vector.load %arg3[%c3_111, %c0_112, %c0_113] : memref<4x1x16xf32, #tpu.memory_space<vmem>>, vector<1x1x16xf32>
    %124 = vector.shape_cast %123 : vector<1x1x16xf32> to vector<1x16xf32>
    %125 = vector.broadcast %124 : vector<1x16xf32> to vector<2x16xf32>
    %126 = arith.addf %122, %125 : vector<2x16xf32>
    %127 = math.tanh %126 : vector<2x16xf32>
    %c0_114 = arith.constant 0 : index
    %c64 = arith.constant 64 : index
    %128 = vector.load %arg0[%c0_114, %c64] : memref<2x128xf32, #tpu.memory_space<vmem>>, vector<2x16xf32>
    %c0_115 = arith.constant 0 : index
    %c0_116 = arith.constant 0 : index
    %c0_117 = arith.constant 0 : index
    %129 = vector.load %arg1[%c0_115, %c0_116, %c0_117] : memref<4x16x16xf32, #tpu.memory_space<vmem>>, vector<1x16x16xf32>
    %130 = vector.shape_cast %129 : vector<1x16x16xf32> to vector<16x16xf32>
    %cst_118 = arith.constant dense<0.000000e+00> : vector<2x16xf32>
    %131 = tpu.matmul %128, %130, %cst_118 {dimension_numbers = #tpu.dot_dimension_numbers<[1], [0], [0], [1], [0, 0, 1, 1], [], []>} : vector<2x16xf32>, vector<16x16xf32>, vector<2x16xf32> -> vector<2x16xf32>
    %c0_119 = arith.constant 0 : index
    %c0_120 = arith.constant 0 : index
    %c0_121 = arith.constant 0 : index
    %132 = vector.load %arg2[%c0_119, %c0_120, %c0_121] : memref<4x16x16xf32, #tpu.memory_space<vmem>>, vector<1x16x16xf32>
    %133 = vector.shape_cast %132 : vector<1x16x16xf32> to vector<16x16xf32>
    %cst_122 = arith.constant dense<0.000000e+00> : vector<2x16xf32>
    %134 = tpu.matmul %91, %133, %cst_122 {dimension_numbers = #tpu.dot_dimension_numbers<[1], [0], [0], [1], [0, 0, 1, 1], [], []>} : vector<2x16xf32>, vector<16x16xf32>, vector<2x16xf32> -> vector<2x16xf32>
    %135 = arith.addf %131, %134 : vector<2x16xf32>
    %c0_123 = arith.constant 0 : index
    %c0_124 = arith.constant 0 : index
    %c0_125 = arith.constant 0 : index
    %136 = vector.load %arg3[%c0_123, %c0_124, %c0_125] : memref<4x1x16xf32, #tpu.memory_space<vmem>>, vector<1x1x16xf32>
    %137 = vector.shape_cast %136 : vector<1x1x16xf32> to vector<1x16xf32>
    %138 = vector.broadcast %137 : vector<1x16xf32> to vector<2x16xf32>
    %139 = arith.addf %135, %138 : vector<2x16xf32>
    %140 = math.tanh %139 : vector<2x16xf32>
    %c1_126 = arith.constant 1 : index
    %c0_127 = arith.constant 0 : index
    %c0_128 = arith.constant 0 : index
    %141 = vector.load %arg1[%c1_126, %c0_127, %c0_128] : memref<4x16x16xf32, #tpu.memory_space<vmem>>, vector<1x16x16xf32>
    %142 = vector.shape_cast %141 : vector<1x16x16xf32> to vector<16x16xf32>
    %cst_129 = arith.constant dense<0.000000e+00> : vector<2x16xf32>
    %143 = tpu.matmul %91, %142, %cst_129 {dimension_numbers = #tpu.dot_dimension_numbers<[1], [0], [0], [1], [0, 0, 1, 1], [], []>} : vector<2x16xf32>, vector<16x16xf32>, vector<2x16xf32> -> vector<2x16xf32>
    %c1_130 = arith.constant 1 : index
    %c0_131 = arith.constant 0 : index
    %c0_132 = arith.constant 0 : index
    %144 = vector.load %arg2[%c1_130, %c0_131, %c0_132] : memref<4x16x16xf32, #tpu.memory_space<vmem>>, vector<1x16x16xf32>
    %145 = vector.shape_cast %144 : vector<1x16x16xf32> to vector<16x16xf32>
    %cst_133 = arith.constant dense<0.000000e+00> : vector<2x16xf32>
    %146 = tpu.matmul %103, %145, %cst_133 {dimension_numbers = #tpu.dot_dimension_numbers<[1], [0], [0], [1], [0, 0, 1, 1], [], []>} : vector<2x16xf32>, vector<16x16xf32>, vector<2x16xf32> -> vector<2x16xf32>
    %147 = arith.addf %143, %146 : vector<2x16xf32>
    %c1_134 = arith.constant 1 : index
    %c0_135 = arith.constant 0 : index
    %c0_136 = arith.constant 0 : index
    %148 = vector.load %arg3[%c1_134, %c0_135, %c0_136] : memref<4x1x16xf32, #tpu.memory_space<vmem>>, vector<1x1x16xf32>
    %149 = vector.shape_cast %148 : vector<1x1x16xf32> to vector<1x16xf32>
    %150 = vector.broadcast %149 : vector<1x16xf32> to vector<2x16xf32>
    %151 = arith.addf %147, %150 : vector<2x16xf32>
    %152 = math.tanh %151 : vector<2x16xf32>
    %c2_137 = arith.constant 2 : index
    %c0_138 = arith.constant 0 : index
    %c0_139 = arith.constant 0 : index
    %153 = vector.load %arg1[%c2_137, %c0_138, %c0_139] : memref<4x16x16xf32, #tpu.memory_space<vmem>>, vector<1x16x16xf32>
    %154 = vector.shape_cast %153 : vector<1x16x16xf32> to vector<16x16xf32>
    %cst_140 = arith.constant dense<0.000000e+00> : vector<2x16xf32>
    %155 = tpu.matmul %103, %154, %cst_140 {dimension_numbers = #tpu.dot_dimension_numbers<[1], [0], [0], [1], [0, 0, 1, 1], [], []>} : vector<2x16xf32>, vector<16x16xf32>, vector<2x16xf32> -> vector<2x16xf32>
    %c2_141 = arith.constant 2 : index
    %c0_142 = arith.constant 0 : index
    %c0_143 = arith.constant 0 : index
    %156 = vector.load %arg2[%c2_141, %c0_142, %c0_143] : memref<4x16x16xf32, #tpu.memory_space<vmem>>, vector<1x16x16xf32>
    %157 = vector.shape_cast %156 : vector<1x16x16xf32> to vector<16x16xf32>
    %cst_144 = arith.constant dense<0.000000e+00> : vector<2x16xf32>
    %158 = tpu.matmul %115, %157, %cst_144 {dimension_numbers = #tpu.dot_dimension_numbers<[1], [0], [0], [1], [0, 0, 1, 1], [], []>} : vector<2x16xf32>, vector<16x16xf32>, vector<2x16xf32> -> vector<2x16xf32>
    %159 = arith.addf %155, %158 : vector<2x16xf32>
    %c2_145 = arith.constant 2 : index
    %c0_146 = arith.constant 0 : index
    %c0_147 = arith.constant 0 : index
    %160 = vector.load %arg3[%c2_145, %c0_146, %c0_147] : memref<4x1x16xf32, #tpu.memory_space<vmem>>, vector<1x1x16xf32>
    %161 = vector.shape_cast %160 : vector<1x1x16xf32> to vector<1x16xf32>
    %162 = vector.broadcast %161 : vector<1x16xf32> to vector<2x16xf32>
    %163 = arith.addf %159, %162 : vector<2x16xf32>
    %164 = math.tanh %163 : vector<2x16xf32>
    %c3_148 = arith.constant 3 : index
    %c0_149 = arith.constant 0 : index
    %c0_150 = arith.constant 0 : index
    %165 = vector.load %arg1[%c3_148, %c0_149, %c0_150] : memref<4x16x16xf32, #tpu.memory_space<vmem>>, vector<1x16x16xf32>
    %166 = vector.shape_cast %165 : vector<1x16x16xf32> to vector<16x16xf32>
    %cst_151 = arith.constant dense<0.000000e+00> : vector<2x16xf32>
    %167 = tpu.matmul %115, %166, %cst_151 {dimension_numbers = #tpu.dot_dimension_numbers<[1], [0], [0], [1], [0, 0, 1, 1], [], []>} : vector<2x16xf32>, vector<16x16xf32>, vector<2x16xf32> -> vector<2x16xf32>
    %c3_152 = arith.constant 3 : index
    %c0_153 = arith.constant 0 : index
    %c0_154 = arith.constant 0 : index
    %168 = vector.load %arg2[%c3_152, %c0_153, %c0_154] : memref<4x16x16xf32, #tpu.memory_space<vmem>>, vector<1x16x16xf32>
    %169 = vector.shape_cast %168 : vector<1x16x16xf32> to vector<16x16xf32>
    %cst_155 = arith.constant dense<0.000000e+00> : vector<2x16xf32>
    %170 = tpu.matmul %127, %169, %cst_155 {dimension_numbers = #tpu.dot_dimension_numbers<[1], [0], [0], [1], [0, 0, 1, 1], [], []>} : vector<2x16xf32>, vector<16x16xf32>, vector<2x16xf32> -> vector<2x16xf32>
    %171 = arith.addf %167, %170 : vector<2x16xf32>
    %c3_156 = arith.constant 3 : index
    %c0_157 = arith.constant 0 : index
    %c0_158 = arith.constant 0 : index
    %172 = vector.load %arg3[%c3_156, %c0_157, %c0_158] : memref<4x1x16xf32, #tpu.memory_space<vmem>>, vector<1x1x16xf32>
    %173 = vector.shape_cast %172 : vector<1x1x16xf32> to vector<1x16xf32>
    %174 = vector.broadcast %173 : vector<1x16xf32> to vector<2x16xf32>
    %175 = arith.addf %171, %174 : vector<2x16xf32>
    %176 = math.tanh %175 : vector<2x16xf32>
    %c0_159 = arith.constant 0 : index
    %c80 = arith.constant 80 : index
    %177 = vector.load %arg0[%c0_159, %c80] : memref<2x128xf32, #tpu.memory_space<vmem>>, vector<2x16xf32>
    %c0_160 = arith.constant 0 : index
    %c0_161 = arith.constant 0 : index
    %c0_162 = arith.constant 0 : index
    %178 = vector.load %arg1[%c0_160, %c0_161, %c0_162] : memref<4x16x16xf32, #tpu.memory_space<vmem>>, vector<1x16x16xf32>
    %179 = vector.shape_cast %178 : vector<1x16x16xf32> to vector<16x16xf32>
    %cst_163 = arith.constant dense<0.000000e+00> : vector<2x16xf32>
    %180 = tpu.matmul %177, %179, %cst_163 {dimension_numbers = #tpu.dot_dimension_numbers<[1], [0], [0], [1], [0, 0, 1, 1], [], []>} : vector<2x16xf32>, vector<16x16xf32>, vector<2x16xf32> -> vector<2x16xf32>
    %c0_164 = arith.constant 0 : index
    %c0_165 = arith.constant 0 : index
    %c0_166 = arith.constant 0 : index
    %181 = vector.load %arg2[%c0_164, %c0_165, %c0_166] : memref<4x16x16xf32, #tpu.memory_space<vmem>>, vector<1x16x16xf32>
    %182 = vector.shape_cast %181 : vector<1x16x16xf32> to vector<16x16xf32>
    %cst_167 = arith.constant dense<0.000000e+00> : vector<2x16xf32>
    %183 = tpu.matmul %140, %182, %cst_167 {dimension_numbers = #tpu.dot_dimension_numbers<[1], [0], [0], [1], [0, 0, 1, 1], [], []>} : vector<2x16xf32>, vector<16x16xf32>, vector<2x16xf32> -> vector<2x16xf32>
    %184 = arith.addf %180, %183 : vector<2x16xf32>
    %c0_168 = arith.constant 0 : index
    %c0_169 = arith.constant 0 : index
    %c0_170 = arith.constant 0 : index
    %185 = vector.load %arg3[%c0_168, %c0_169, %c0_170] : memref<4x1x16xf32, #tpu.memory_space<vmem>>, vector<1x1x16xf32>
    %186 = vector.shape_cast %185 : vector<1x1x16xf32> to vector<1x16xf32>
    %187 = vector.broadcast %186 : vector<1x16xf32> to vector<2x16xf32>
    %188 = arith.addf %184, %187 : vector<2x16xf32>
    %189 = math.tanh %188 : vector<2x16xf32>
    %c1_171 = arith.constant 1 : index
    %c0_172 = arith.constant 0 : index
    %c0_173 = arith.constant 0 : index
    %190 = vector.load %arg1[%c1_171, %c0_172, %c0_173] : memref<4x16x16xf32, #tpu.memory_space<vmem>>, vector<1x16x16xf32>
    %191 = vector.shape_cast %190 : vector<1x16x16xf32> to vector<16x16xf32>
    %cst_174 = arith.constant dense<0.000000e+00> : vector<2x16xf32>
    %192 = tpu.matmul %140, %191, %cst_174 {dimension_numbers = #tpu.dot_dimension_numbers<[1], [0], [0], [1], [0, 0, 1, 1], [], []>} : vector<2x16xf32>, vector<16x16xf32>, vector<2x16xf32> -> vector<2x16xf32>
    %c1_175 = arith.constant 1 : index
    %c0_176 = arith.constant 0 : index
    %c0_177 = arith.constant 0 : index
    %193 = vector.load %arg2[%c1_175, %c0_176, %c0_177] : memref<4x16x16xf32, #tpu.memory_space<vmem>>, vector<1x16x16xf32>
    %194 = vector.shape_cast %193 : vector<1x16x16xf32> to vector<16x16xf32>
    %cst_178 = arith.constant dense<0.000000e+00> : vector<2x16xf32>
    %195 = tpu.matmul %152, %194, %cst_178 {dimension_numbers = #tpu.dot_dimension_numbers<[1], [0], [0], [1], [0, 0, 1, 1], [], []>} : vector<2x16xf32>, vector<16x16xf32>, vector<2x16xf32> -> vector<2x16xf32>
    %196 = arith.addf %192, %195 : vector<2x16xf32>
    %c1_179 = arith.constant 1 : index
    %c0_180 = arith.constant 0 : index
    %c0_181 = arith.constant 0 : index
    %197 = vector.load %arg3[%c1_179, %c0_180, %c0_181] : memref<4x1x16xf32, #tpu.memory_space<vmem>>, vector<1x1x16xf32>
    %198 = vector.shape_cast %197 : vector<1x1x16xf32> to vector<1x16xf32>
    %199 = vector.broadcast %198 : vector<1x16xf32> to vector<2x16xf32>
    %200 = arith.addf %196, %199 : vector<2x16xf32>
    %201 = math.tanh %200 : vector<2x16xf32>
    %c2_182 = arith.constant 2 : index
    %c0_183 = arith.constant 0 : index
    %c0_184 = arith.constant 0 : index
    %202 = vector.load %arg1[%c2_182, %c0_183, %c0_184] : memref<4x16x16xf32, #tpu.memory_space<vmem>>, vector<1x16x16xf32>
    %203 = vector.shape_cast %202 : vector<1x16x16xf32> to vector<16x16xf32>
    %cst_185 = arith.constant dense<0.000000e+00> : vector<2x16xf32>
    %204 = tpu.matmul %152, %203, %cst_185 {dimension_numbers = #tpu.dot_dimension_numbers<[1], [0], [0], [1], [0, 0, 1, 1], [], []>} : vector<2x16xf32>, vector<16x16xf32>, vector<2x16xf32> -> vector<2x16xf32>
    %c2_186 = arith.constant 2 : index
    %c0_187 = arith.constant 0 : index
    %c0_188 = arith.constant 0 : index
    %205 = vector.load %arg2[%c2_186, %c0_187, %c0_188] : memref<4x16x16xf32, #tpu.memory_space<vmem>>, vector<1x16x16xf32>
    %206 = vector.shape_cast %205 : vector<1x16x16xf32> to vector<16x16xf32>
    %cst_189 = arith.constant dense<0.000000e+00> : vector<2x16xf32>
    %207 = tpu.matmul %164, %206, %cst_189 {dimension_numbers = #tpu.dot_dimension_numbers<[1], [0], [0], [1], [0, 0, 1, 1], [], []>} : vector<2x16xf32>, vector<16x16xf32>, vector<2x16xf32> -> vector<2x16xf32>
    %208 = arith.addf %204, %207 : vector<2x16xf32>
    %c2_190 = arith.constant 2 : index
    %c0_191 = arith.constant 0 : index
    %c0_192 = arith.constant 0 : index
    %209 = vector.load %arg3[%c2_190, %c0_191, %c0_192] : memref<4x1x16xf32, #tpu.memory_space<vmem>>, vector<1x1x16xf32>
    %210 = vector.shape_cast %209 : vector<1x1x16xf32> to vector<1x16xf32>
    %211 = vector.broadcast %210 : vector<1x16xf32> to vector<2x16xf32>
    %212 = arith.addf %208, %211 : vector<2x16xf32>
    %213 = math.tanh %212 : vector<2x16xf32>
    %c3_193 = arith.constant 3 : index
    %c0_194 = arith.constant 0 : index
    %c0_195 = arith.constant 0 : index
    %214 = vector.load %arg1[%c3_193, %c0_194, %c0_195] : memref<4x16x16xf32, #tpu.memory_space<vmem>>, vector<1x16x16xf32>
    %215 = vector.shape_cast %214 : vector<1x16x16xf32> to vector<16x16xf32>
    %cst_196 = arith.constant dense<0.000000e+00> : vector<2x16xf32>
    %216 = tpu.matmul %164, %215, %cst_196 {dimension_numbers = #tpu.dot_dimension_numbers<[1], [0], [0], [1], [0, 0, 1, 1], [], []>} : vector<2x16xf32>, vector<16x16xf32>, vector<2x16xf32> -> vector<2x16xf32>
    %c3_197 = arith.constant 3 : index
    %c0_198 = arith.constant 0 : index
    %c0_199 = arith.constant 0 : index
    %217 = vector.load %arg2[%c3_197, %c0_198, %c0_199] : memref<4x16x16xf32, #tpu.memory_space<vmem>>, vector<1x16x16xf32>
    %218 = vector.shape_cast %217 : vector<1x16x16xf32> to vector<16x16xf32>
    %cst_200 = arith.constant dense<0.000000e+00> : vector<2x16xf32>
    %219 = tpu.matmul %176, %218, %cst_200 {dimension_numbers = #tpu.dot_dimension_numbers<[1], [0], [0], [1], [0, 0, 1, 1], [], []>} : vector<2x16xf32>, vector<16x16xf32>, vector<2x16xf32> -> vector<2x16xf32>
    %220 = arith.addf %216, %219 : vector<2x16xf32>
    %c3_201 = arith.constant 3 : index
    %c0_202 = arith.constant 0 : index
    %c0_203 = arith.constant 0 : index
    %221 = vector.load %arg3[%c3_201, %c0_202, %c0_203] : memref<4x1x16xf32, #tpu.memory_space<vmem>>, vector<1x1x16xf32>
    %222 = vector.shape_cast %221 : vector<1x1x16xf32> to vector<1x16xf32>
    %223 = vector.broadcast %222 : vector<1x16xf32> to vector<2x16xf32>
    %224 = arith.addf %220, %223 : vector<2x16xf32>
    %225 = math.tanh %224 : vector<2x16xf32>
    %c0_204 = arith.constant 0 : index
    %c96 = arith.constant 96 : index
    %226 = vector.load %arg0[%c0_204, %c96] : memref<2x128xf32, #tpu.memory_space<vmem>>, vector<2x16xf32>
    %c0_205 = arith.constant 0 : index
    %c0_206 = arith.constant 0 : index
    %c0_207 = arith.constant 0 : index
    %227 = vector.load %arg1[%c0_205, %c0_206, %c0_207] : memref<4x16x16xf32, #tpu.memory_space<vmem>>, vector<1x16x16xf32>
    %228 = vector.shape_cast %227 : vector<1x16x16xf32> to vector<16x16xf32>
    %cst_208 = arith.constant dense<0.000000e+00> : vector<2x16xf32>
    %229 = tpu.matmul %226, %228, %cst_208 {dimension_numbers = #tpu.dot_dimension_numbers<[1], [0], [0], [1], [0, 0, 1, 1], [], []>} : vector<2x16xf32>, vector<16x16xf32>, vector<2x16xf32> -> vector<2x16xf32>
    %c0_209 = arith.constant 0 : index
    %c0_210 = arith.constant 0 : index
    %c0_211 = arith.constant 0 : index
    %230 = vector.load %arg2[%c0_209, %c0_210, %c0_211] : memref<4x16x16xf32, #tpu.memory_space<vmem>>, vector<1x16x16xf32>
    %231 = vector.shape_cast %230 : vector<1x16x16xf32> to vector<16x16xf32>
    %cst_212 = arith.constant dense<0.000000e+00> : vector<2x16xf32>
    %232 = tpu.matmul %189, %231, %cst_212 {dimension_numbers = #tpu.dot_dimension_numbers<[1], [0], [0], [1], [0, 0, 1, 1], [], []>} : vector<2x16xf32>, vector<16x16xf32>, vector<2x16xf32> -> vector<2x16xf32>
    %233 = arith.addf %229, %232 : vector<2x16xf32>
    %c0_213 = arith.constant 0 : index
    %c0_214 = arith.constant 0 : index
    %c0_215 = arith.constant 0 : index
    %234 = vector.load %arg3[%c0_213, %c0_214, %c0_215] : memref<4x1x16xf32, #tpu.memory_space<vmem>>, vector<1x1x16xf32>
    %235 = vector.shape_cast %234 : vector<1x1x16xf32> to vector<1x16xf32>
    %236 = vector.broadcast %235 : vector<1x16xf32> to vector<2x16xf32>
    %237 = arith.addf %233, %236 : vector<2x16xf32>
    %238 = math.tanh %237 : vector<2x16xf32>
    %c1_216 = arith.constant 1 : index
    %c0_217 = arith.constant 0 : index
    %c0_218 = arith.constant 0 : index
    %239 = vector.load %arg1[%c1_216, %c0_217, %c0_218] : memref<4x16x16xf32, #tpu.memory_space<vmem>>, vector<1x16x16xf32>
    %240 = vector.shape_cast %239 : vector<1x16x16xf32> to vector<16x16xf32>
    %cst_219 = arith.constant dense<0.000000e+00> : vector<2x16xf32>
    %241 = tpu.matmul %189, %240, %cst_219 {dimension_numbers = #tpu.dot_dimension_numbers<[1], [0], [0], [1], [0, 0, 1, 1], [], []>} : vector<2x16xf32>, vector<16x16xf32>, vector<2x16xf32> -> vector<2x16xf32>
    %c1_220 = arith.constant 1 : index
    %c0_221 = arith.constant 0 : index
    %c0_222 = arith.constant 0 : index
    %242 = vector.load %arg2[%c1_220, %c0_221, %c0_222] : memref<4x16x16xf32, #tpu.memory_space<vmem>>, vector<1x16x16xf32>
    %243 = vector.shape_cast %242 : vector<1x16x16xf32> to vector<16x16xf32>
    %cst_223 = arith.constant dense<0.000000e+00> : vector<2x16xf32>
    %244 = tpu.matmul %201, %243, %cst_223 {dimension_numbers = #tpu.dot_dimension_numbers<[1], [0], [0], [1], [0, 0, 1, 1], [], []>} : vector<2x16xf32>, vector<16x16xf32>, vector<2x16xf32> -> vector<2x16xf32>
    %245 = arith.addf %241, %244 : vector<2x16xf32>
    %c1_224 = arith.constant 1 : index
    %c0_225 = arith.constant 0 : index
    %c0_226 = arith.constant 0 : index
    %246 = vector.load %arg3[%c1_224, %c0_225, %c0_226] : memref<4x1x16xf32, #tpu.memory_space<vmem>>, vector<1x1x16xf32>
    %247 = vector.shape_cast %246 : vector<1x1x16xf32> to vector<1x16xf32>
    %248 = vector.broadcast %247 : vector<1x16xf32> to vector<2x16xf32>
    %249 = arith.addf %245, %248 : vector<2x16xf32>
    %250 = math.tanh %249 : vector<2x16xf32>
    %c2_227 = arith.constant 2 : index
    %c0_228 = arith.constant 0 : index
    %c0_229 = arith.constant 0 : index
    %251 = vector.load %arg1[%c2_227, %c0_228, %c0_229] : memref<4x16x16xf32, #tpu.memory_space<vmem>>, vector<1x16x16xf32>
    %252 = vector.shape_cast %251 : vector<1x16x16xf32> to vector<16x16xf32>
    %cst_230 = arith.constant dense<0.000000e+00> : vector<2x16xf32>
    %253 = tpu.matmul %201, %252, %cst_230 {dimension_numbers = #tpu.dot_dimension_numbers<[1], [0], [0], [1], [0, 0, 1, 1], [], []>} : vector<2x16xf32>, vector<16x16xf32>, vector<2x16xf32> -> vector<2x16xf32>
    %c2_231 = arith.constant 2 : index
    %c0_232 = arith.constant 0 : index
    %c0_233 = arith.constant 0 : index
    %254 = vector.load %arg2[%c2_231, %c0_232, %c0_233] : memref<4x16x16xf32, #tpu.memory_space<vmem>>, vector<1x16x16xf32>
    %255 = vector.shape_cast %254 : vector<1x16x16xf32> to vector<16x16xf32>
    %cst_234 = arith.constant dense<0.000000e+00> : vector<2x16xf32>
    %256 = tpu.matmul %213, %255, %cst_234 {dimension_numbers = #tpu.dot_dimension_numbers<[1], [0], [0], [1], [0, 0, 1, 1], [], []>} : vector<2x16xf32>, vector<16x16xf32>, vector<2x16xf32> -> vector<2x16xf32>
    %257 = arith.addf %253, %256 : vector<2x16xf32>
    %c2_235 = arith.constant 2 : index
    %c0_236 = arith.constant 0 : index
    %c0_237 = arith.constant 0 : index
    %258 = vector.load %arg3[%c2_235, %c0_236, %c0_237] : memref<4x1x16xf32, #tpu.memory_space<vmem>>, vector<1x1x16xf32>
    %259 = vector.shape_cast %258 : vector<1x1x16xf32> to vector<1x16xf32>
    %260 = vector.broadcast %259 : vector<1x16xf32> to vector<2x16xf32>
    %261 = arith.addf %257, %260 : vector<2x16xf32>
    %262 = math.tanh %261 : vector<2x16xf32>
    %c3_238 = arith.constant 3 : index
    %c0_239 = arith.constant 0 : index
    %c0_240 = arith.constant 0 : index
    %263 = vector.load %arg1[%c3_238, %c0_239, %c0_240] : memref<4x16x16xf32, #tpu.memory_space<vmem>>, vector<1x16x16xf32>
    %264 = vector.shape_cast %263 : vector<1x16x16xf32> to vector<16x16xf32>
    %cst_241 = arith.constant dense<0.000000e+00> : vector<2x16xf32>
    %265 = tpu.matmul %213, %264, %cst_241 {dimension_numbers = #tpu.dot_dimension_numbers<[1], [0], [0], [1], [0, 0, 1, 1], [], []>} : vector<2x16xf32>, vector<16x16xf32>, vector<2x16xf32> -> vector<2x16xf32>
    %c3_242 = arith.constant 3 : index
    %c0_243 = arith.constant 0 : index
    %c0_244 = arith.constant 0 : index
    %266 = vector.load %arg2[%c3_242, %c0_243, %c0_244] : memref<4x16x16xf32, #tpu.memory_space<vmem>>, vector<1x16x16xf32>
    %267 = vector.shape_cast %266 : vector<1x16x16xf32> to vector<16x16xf32>
    %cst_245 = arith.constant dense<0.000000e+00> : vector<2x16xf32>
    %268 = tpu.matmul %225, %267, %cst_245 {dimension_numbers = #tpu.dot_dimension_numbers<[1], [0], [0], [1], [0, 0, 1, 1], [], []>} : vector<2x16xf32>, vector<16x16xf32>, vector<2x16xf32> -> vector<2x16xf32>
    %269 = arith.addf %265, %268 : vector<2x16xf32>
    %c3_246 = arith.constant 3 : index
    %c0_247 = arith.constant 0 : index
    %c0_248 = arith.constant 0 : index
    %270 = vector.load %arg3[%c3_246, %c0_247, %c0_248] : memref<4x1x16xf32, #tpu.memory_space<vmem>>, vector<1x1x16xf32>
    %271 = vector.shape_cast %270 : vector<1x1x16xf32> to vector<1x16xf32>
    %272 = vector.broadcast %271 : vector<1x16xf32> to vector<2x16xf32>
    %273 = arith.addf %269, %272 : vector<2x16xf32>
    %274 = math.tanh %273 : vector<2x16xf32>
    %c0_249 = arith.constant 0 : index
    %c112 = arith.constant 112 : index
    %275 = vector.load %arg0[%c0_249, %c112] : memref<2x128xf32, #tpu.memory_space<vmem>>, vector<2x16xf32>
    %c0_250 = arith.constant 0 : index
    %c0_251 = arith.constant 0 : index
    %c0_252 = arith.constant 0 : index
    %276 = vector.load %arg1[%c0_250, %c0_251, %c0_252] : memref<4x16x16xf32, #tpu.memory_space<vmem>>, vector<1x16x16xf32>
    %277 = vector.shape_cast %276 : vector<1x16x16xf32> to vector<16x16xf32>
    %cst_253 = arith.constant dense<0.000000e+00> : vector<2x16xf32>
    %278 = tpu.matmul %275, %277, %cst_253 {dimension_numbers = #tpu.dot_dimension_numbers<[1], [0], [0], [1], [0, 0, 1, 1], [], []>} : vector<2x16xf32>, vector<16x16xf32>, vector<2x16xf32> -> vector<2x16xf32>
    %c0_254 = arith.constant 0 : index
    %c0_255 = arith.constant 0 : index
    %c0_256 = arith.constant 0 : index
    %279 = vector.load %arg2[%c0_254, %c0_255, %c0_256] : memref<4x16x16xf32, #tpu.memory_space<vmem>>, vector<1x16x16xf32>
    %280 = vector.shape_cast %279 : vector<1x16x16xf32> to vector<16x16xf32>
    %cst_257 = arith.constant dense<0.000000e+00> : vector<2x16xf32>
    %281 = tpu.matmul %238, %280, %cst_257 {dimension_numbers = #tpu.dot_dimension_numbers<[1], [0], [0], [1], [0, 0, 1, 1], [], []>} : vector<2x16xf32>, vector<16x16xf32>, vector<2x16xf32> -> vector<2x16xf32>
    %282 = arith.addf %278, %281 : vector<2x16xf32>
    %c0_258 = arith.constant 0 : index
    %c0_259 = arith.constant 0 : index
    %c0_260 = arith.constant 0 : index
    %283 = vector.load %arg3[%c0_258, %c0_259, %c0_260] : memref<4x1x16xf32, #tpu.memory_space<vmem>>, vector<1x1x16xf32>
    %284 = vector.shape_cast %283 : vector<1x1x16xf32> to vector<1x16xf32>
    %285 = vector.broadcast %284 : vector<1x16xf32> to vector<2x16xf32>
    %286 = arith.addf %282, %285 : vector<2x16xf32>
    %287 = math.tanh %286 : vector<2x16xf32>
    %c1_261 = arith.constant 1 : index
    %c0_262 = arith.constant 0 : index
    %c0_263 = arith.constant 0 : index
    %288 = vector.load %arg1[%c1_261, %c0_262, %c0_263] : memref<4x16x16xf32, #tpu.memory_space<vmem>>, vector<1x16x16xf32>
    %289 = vector.shape_cast %288 : vector<1x16x16xf32> to vector<16x16xf32>
    %cst_264 = arith.constant dense<0.000000e+00> : vector<2x16xf32>
    %290 = tpu.matmul %238, %289, %cst_264 {dimension_numbers = #tpu.dot_dimension_numbers<[1], [0], [0], [1], [0, 0, 1, 1], [], []>} : vector<2x16xf32>, vector<16x16xf32>, vector<2x16xf32> -> vector<2x16xf32>
    %c1_265 = arith.constant 1 : index
    %c0_266 = arith.constant 0 : index
    %c0_267 = arith.constant 0 : index
    %291 = vector.load %arg2[%c1_265, %c0_266, %c0_267] : memref<4x16x16xf32, #tpu.memory_space<vmem>>, vector<1x16x16xf32>
    %292 = vector.shape_cast %291 : vector<1x16x16xf32> to vector<16x16xf32>
    %cst_268 = arith.constant dense<0.000000e+00> : vector<2x16xf32>
    %293 = tpu.matmul %250, %292, %cst_268 {dimension_numbers = #tpu.dot_dimension_numbers<[1], [0], [0], [1], [0, 0, 1, 1], [], []>} : vector<2x16xf32>, vector<16x16xf32>, vector<2x16xf32> -> vector<2x16xf32>
    %294 = arith.addf %290, %293 : vector<2x16xf32>
    %c1_269 = arith.constant 1 : index
    %c0_270 = arith.constant 0 : index
    %c0_271 = arith.constant 0 : index
    %295 = vector.load %arg3[%c1_269, %c0_270, %c0_271] : memref<4x1x16xf32, #tpu.memory_space<vmem>>, vector<1x1x16xf32>
    %296 = vector.shape_cast %295 : vector<1x1x16xf32> to vector<1x16xf32>
    %297 = vector.broadcast %296 : vector<1x16xf32> to vector<2x16xf32>
    %298 = arith.addf %294, %297 : vector<2x16xf32>
    %299 = math.tanh %298 : vector<2x16xf32>
    %c2_272 = arith.constant 2 : index
    %c0_273 = arith.constant 0 : index
    %c0_274 = arith.constant 0 : index
    %300 = vector.load %arg1[%c2_272, %c0_273, %c0_274] : memref<4x16x16xf32, #tpu.memory_space<vmem>>, vector<1x16x16xf32>
    %301 = vector.shape_cast %300 : vector<1x16x16xf32> to vector<16x16xf32>
    %cst_275 = arith.constant dense<0.000000e+00> : vector<2x16xf32>
    %302 = tpu.matmul %250, %301, %cst_275 {dimension_numbers = #tpu.dot_dimension_numbers<[1], [0], [0], [1], [0, 0, 1, 1], [], []>} : vector<2x16xf32>, vector<16x16xf32>, vector<2x16xf32> -> vector<2x16xf32>
    %c2_276 = arith.constant 2 : index
    %c0_277 = arith.constant 0 : index
    %c0_278 = arith.constant 0 : index
    %303 = vector.load %arg2[%c2_276, %c0_277, %c0_278] : memref<4x16x16xf32, #tpu.memory_space<vmem>>, vector<1x16x16xf32>
    %304 = vector.shape_cast %303 : vector<1x16x16xf32> to vector<16x16xf32>
    %cst_279 = arith.constant dense<0.000000e+00> : vector<2x16xf32>
    %305 = tpu.matmul %262, %304, %cst_279 {dimension_numbers = #tpu.dot_dimension_numbers<[1], [0], [0], [1], [0, 0, 1, 1], [], []>} : vector<2x16xf32>, vector<16x16xf32>, vector<2x16xf32> -> vector<2x16xf32>
    %306 = arith.addf %302, %305 : vector<2x16xf32>
    %c2_280 = arith.constant 2 : index
    %c0_281 = arith.constant 0 : index
    %c0_282 = arith.constant 0 : index
    %307 = vector.load %arg3[%c2_280, %c0_281, %c0_282] : memref<4x1x16xf32, #tpu.memory_space<vmem>>, vector<1x1x16xf32>
    %308 = vector.shape_cast %307 : vector<1x1x16xf32> to vector<1x16xf32>
    %309 = vector.broadcast %308 : vector<1x16xf32> to vector<2x16xf32>
    %310 = arith.addf %306, %309 : vector<2x16xf32>
    %311 = math.tanh %310 : vector<2x16xf32>
    %c3_283 = arith.constant 3 : index
    %c0_284 = arith.constant 0 : index
    %c0_285 = arith.constant 0 : index
    %312 = vector.load %arg1[%c3_283, %c0_284, %c0_285] : memref<4x16x16xf32, #tpu.memory_space<vmem>>, vector<1x16x16xf32>
    %313 = vector.shape_cast %312 : vector<1x16x16xf32> to vector<16x16xf32>
    %cst_286 = arith.constant dense<0.000000e+00> : vector<2x16xf32>
    %314 = tpu.matmul %262, %313, %cst_286 {dimension_numbers = #tpu.dot_dimension_numbers<[1], [0], [0], [1], [0, 0, 1, 1], [], []>} : vector<2x16xf32>, vector<16x16xf32>, vector<2x16xf32> -> vector<2x16xf32>
    %c3_287 = arith.constant 3 : index
    %c0_288 = arith.constant 0 : index
    %c0_289 = arith.constant 0 : index
    %315 = vector.load %arg2[%c3_287, %c0_288, %c0_289] : memref<4x16x16xf32, #tpu.memory_space<vmem>>, vector<1x16x16xf32>
    %316 = vector.shape_cast %315 : vector<1x16x16xf32> to vector<16x16xf32>
    %cst_290 = arith.constant dense<0.000000e+00> : vector<2x16xf32>
    %317 = tpu.matmul %274, %316, %cst_290 {dimension_numbers = #tpu.dot_dimension_numbers<[1], [0], [0], [1], [0, 0, 1, 1], [], []>} : vector<2x16xf32>, vector<16x16xf32>, vector<2x16xf32> -> vector<2x16xf32>
    %318 = arith.addf %314, %317 : vector<2x16xf32>
    %c3_291 = arith.constant 3 : index
    %c0_292 = arith.constant 0 : index
    %c0_293 = arith.constant 0 : index
    %319 = vector.load %arg3[%c3_291, %c0_292, %c0_293] : memref<4x1x16xf32, #tpu.memory_space<vmem>>, vector<1x1x16xf32>
    %320 = vector.shape_cast %319 : vector<1x1x16xf32> to vector<1x16xf32>
    %321 = vector.broadcast %320 : vector<1x16xf32> to vector<2x16xf32>
    %322 = arith.addf %318, %321 : vector<2x16xf32>
    %323 = math.tanh %322 : vector<2x16xf32>
    %c1_294 = arith.constant 1 : index
    %c0_295 = arith.constant 0 : index
    %c0_296 = arith.constant 0 : index
    %324 = vector.load %arg1[%c1_294, %c0_295, %c0_296] : memref<4x16x16xf32, #tpu.memory_space<vmem>>, vector<1x16x16xf32>
    %325 = vector.shape_cast %324 : vector<1x16x16xf32> to vector<16x16xf32>
    %cst_297 = arith.constant dense<0.000000e+00> : vector<2x16xf32>
    %326 = tpu.matmul %287, %325, %cst_297 {dimension_numbers = #tpu.dot_dimension_numbers<[1], [0], [0], [1], [0, 0, 1, 1], [], []>} : vector<2x16xf32>, vector<16x16xf32>, vector<2x16xf32> -> vector<2x16xf32>
    %c1_298 = arith.constant 1 : index
    %c0_299 = arith.constant 0 : index
    %c0_300 = arith.constant 0 : index
    %327 = vector.load %arg2[%c1_298, %c0_299, %c0_300] : memref<4x16x16xf32, #tpu.memory_space<vmem>>, vector<1x16x16xf32>
    %328 = vector.shape_cast %327 : vector<1x16x16xf32> to vector<16x16xf32>
    %cst_301 = arith.constant dense<0.000000e+00> : vector<2x16xf32>
    %329 = tpu.matmul %299, %328, %cst_301 {dimension_numbers = #tpu.dot_dimension_numbers<[1], [0], [0], [1], [0, 0, 1, 1], [], []>} : vector<2x16xf32>, vector<16x16xf32>, vector<2x16xf32> -> vector<2x16xf32>
    %330 = arith.addf %326, %329 : vector<2x16xf32>
    %c1_302 = arith.constant 1 : index
    %c0_303 = arith.constant 0 : index
    %c0_304 = arith.constant 0 : index
    %331 = vector.load %arg3[%c1_302, %c0_303, %c0_304] : memref<4x1x16xf32, #tpu.memory_space<vmem>>, vector<1x1x16xf32>
    %332 = vector.shape_cast %331 : vector<1x1x16xf32> to vector<1x16xf32>
    %333 = vector.broadcast %332 : vector<1x16xf32> to vector<2x16xf32>
    %334 = arith.addf %330, %333 : vector<2x16xf32>
    %335 = math.tanh %334 : vector<2x16xf32>
    %c2_305 = arith.constant 2 : index
    %c0_306 = arith.constant 0 : index
    %c0_307 = arith.constant 0 : index
    %336 = vector.load %arg1[%c2_305, %c0_306, %c0_307] : memref<4x16x16xf32, #tpu.memory_space<vmem>>, vector<1x16x16xf32>
    %337 = vector.shape_cast %336 : vector<1x16x16xf32> to vector<16x16xf32>
    %cst_308 = arith.constant dense<0.000000e+00> : vector<2x16xf32>
    %338 = tpu.matmul %299, %337, %cst_308 {dimension_numbers = #tpu.dot_dimension_numbers<[1], [0], [0], [1], [0, 0, 1, 1], [], []>} : vector<2x16xf32>, vector<16x16xf32>, vector<2x16xf32> -> vector<2x16xf32>
    %c2_309 = arith.constant 2 : index
    %c0_310 = arith.constant 0 : index
    %c0_311 = arith.constant 0 : index
    %339 = vector.load %arg2[%c2_309, %c0_310, %c0_311] : memref<4x16x16xf32, #tpu.memory_space<vmem>>, vector<1x16x16xf32>
    %340 = vector.shape_cast %339 : vector<1x16x16xf32> to vector<16x16xf32>
    %cst_312 = arith.constant dense<0.000000e+00> : vector<2x16xf32>
    %341 = tpu.matmul %311, %340, %cst_312 {dimension_numbers = #tpu.dot_dimension_numbers<[1], [0], [0], [1], [0, 0, 1, 1], [], []>} : vector<2x16xf32>, vector<16x16xf32>, vector<2x16xf32> -> vector<2x16xf32>
    %342 = arith.addf %338, %341 : vector<2x16xf32>
    %c2_313 = arith.constant 2 : index
    %c0_314 = arith.constant 0 : index
    %c0_315 = arith.constant 0 : index
    %343 = vector.load %arg3[%c2_313, %c0_314, %c0_315] : memref<4x1x16xf32, #tpu.memory_space<vmem>>, vector<1x1x16xf32>
    %344 = vector.shape_cast %343 : vector<1x1x16xf32> to vector<1x16xf32>
    %345 = vector.broadcast %344 : vector<1x16xf32> to vector<2x16xf32>
    %346 = arith.addf %342, %345 : vector<2x16xf32>
    %347 = math.tanh %346 : vector<2x16xf32>
    %c3_316 = arith.constant 3 : index
    %c0_317 = arith.constant 0 : index
    %c0_318 = arith.constant 0 : index
    %348 = vector.load %arg1[%c3_316, %c0_317, %c0_318] : memref<4x16x16xf32, #tpu.memory_space<vmem>>, vector<1x16x16xf32>
    %349 = vector.shape_cast %348 : vector<1x16x16xf32> to vector<16x16xf32>
    %cst_319 = arith.constant dense<0.000000e+00> : vector<2x16xf32>
    %350 = tpu.matmul %311, %349, %cst_319 {dimension_numbers = #tpu.dot_dimension_numbers<[1], [0], [0], [1], [0, 0, 1, 1], [], []>} : vector<2x16xf32>, vector<16x16xf32>, vector<2x16xf32> -> vector<2x16xf32>
    %c3_320 = arith.constant 3 : index
    %c0_321 = arith.constant 0 : index
    %c0_322 = arith.constant 0 : index
    %351 = vector.load %arg2[%c3_320, %c0_321, %c0_322] : memref<4x16x16xf32, #tpu.memory_space<vmem>>, vector<1x16x16xf32>
    %352 = vector.shape_cast %351 : vector<1x16x16xf32> to vector<16x16xf32>
    %cst_323 = arith.constant dense<0.000000e+00> : vector<2x16xf32>
    %353 = tpu.matmul %323, %352, %cst_323 {dimension_numbers = #tpu.dot_dimension_numbers<[1], [0], [0], [1], [0, 0, 1, 1], [], []>} : vector<2x16xf32>, vector<16x16xf32>, vector<2x16xf32> -> vector<2x16xf32>
    %354 = arith.addf %350, %353 : vector<2x16xf32>
    %c3_324 = arith.constant 3 : index
    %c0_325 = arith.constant 0 : index
    %c0_326 = arith.constant 0 : index
    %355 = vector.load %arg3[%c3_324, %c0_325, %c0_326] : memref<4x1x16xf32, #tpu.memory_space<vmem>>, vector<1x1x16xf32>
    %356 = vector.shape_cast %355 : vector<1x1x16xf32> to vector<1x16xf32>
    %357 = vector.broadcast %356 : vector<1x16xf32> to vector<2x16xf32>
    %358 = arith.addf %354, %357 : vector<2x16xf32>
    %359 = math.tanh %358 : vector<2x16xf32>
    %c2_327 = arith.constant 2 : index
    %c0_328 = arith.constant 0 : index
    %c0_329 = arith.constant 0 : index
    %360 = vector.load %arg1[%c2_327, %c0_328, %c0_329] : memref<4x16x16xf32, #tpu.memory_space<vmem>>, vector<1x16x16xf32>
    %361 = vector.shape_cast %360 : vector<1x16x16xf32> to vector<16x16xf32>
    %cst_330 = arith.constant dense<0.000000e+00> : vector<2x16xf32>
    %362 = tpu.matmul %335, %361, %cst_330 {dimension_numbers = #tpu.dot_dimension_numbers<[1], [0], [0], [1], [0, 0, 1, 1], [], []>} : vector<2x16xf32>, vector<16x16xf32>, vector<2x16xf32> -> vector<2x16xf32>
    %c2_331 = arith.constant 2 : index
    %c0_332 = arith.constant 0 : index
    %c0_333 = arith.constant 0 : index
    %363 = vector.load %arg2[%c2_331, %c0_332, %c0_333] : memref<4x16x16xf32, #tpu.memory_space<vmem>>, vector<1x16x16xf32>
    %364 = vector.shape_cast %363 : vector<1x16x16xf32> to vector<16x16xf32>
    %cst_334 = arith.constant dense<0.000000e+00> : vector<2x16xf32>
    %365 = tpu.matmul %347, %364, %cst_334 {dimension_numbers = #tpu.dot_dimension_numbers<[1], [0], [0], [1], [0, 0, 1, 1], [], []>} : vector<2x16xf32>, vector<16x16xf32>, vector<2x16xf32> -> vector<2x16xf32>
    %366 = arith.addf %362, %365 : vector<2x16xf32>
    %c2_335 = arith.constant 2 : index
    %c0_336 = arith.constant 0 : index
    %c0_337 = arith.constant 0 : index
    %367 = vector.load %arg3[%c2_335, %c0_336, %c0_337] : memref<4x1x16xf32, #tpu.memory_space<vmem>>, vector<1x1x16xf32>
    %368 = vector.shape_cast %367 : vector<1x1x16xf32> to vector<1x16xf32>
    %369 = vector.broadcast %368 : vector<1x16xf32> to vector<2x16xf32>
    %370 = arith.addf %366, %369 : vector<2x16xf32>
    %371 = math.tanh %370 : vector<2x16xf32>
    %c3_338 = arith.constant 3 : index
    %c0_339 = arith.constant 0 : index
    %c0_340 = arith.constant 0 : index
    %372 = vector.load %arg1[%c3_338, %c0_339, %c0_340] : memref<4x16x16xf32, #tpu.memory_space<vmem>>, vector<1x16x16xf32>
    %373 = vector.shape_cast %372 : vector<1x16x16xf32> to vector<16x16xf32>
    %cst_341 = arith.constant dense<0.000000e+00> : vector<2x16xf32>
    %374 = tpu.matmul %347, %373, %cst_341 {dimension_numbers = #tpu.dot_dimension_numbers<[1], [0], [0], [1], [0, 0, 1, 1], [], []>} : vector<2x16xf32>, vector<16x16xf32>, vector<2x16xf32> -> vector<2x16xf32>
    %c3_342 = arith.constant 3 : index
    %c0_343 = arith.constant 0 : index
    %c0_344 = arith.constant 0 : index
    %375 = vector.load %arg2[%c3_342, %c0_343, %c0_344] : memref<4x16x16xf32, #tpu.memory_space<vmem>>, vector<1x16x16xf32>
    %376 = vector.shape_cast %375 : vector<1x16x16xf32> to vector<16x16xf32>
    %cst_345 = arith.constant dense<0.000000e+00> : vector<2x16xf32>
    %377 = tpu.matmul %359, %376, %cst_345 {dimension_numbers = #tpu.dot_dimension_numbers<[1], [0], [0], [1], [0, 0, 1, 1], [], []>} : vector<2x16xf32>, vector<16x16xf32>, vector<2x16xf32> -> vector<2x16xf32>
    %378 = arith.addf %374, %377 : vector<2x16xf32>
    %c3_346 = arith.constant 3 : index
    %c0_347 = arith.constant 0 : index
    %c0_348 = arith.constant 0 : index
    %379 = vector.load %arg3[%c3_346, %c0_347, %c0_348] : memref<4x1x16xf32, #tpu.memory_space<vmem>>, vector<1x1x16xf32>
    %380 = vector.shape_cast %379 : vector<1x1x16xf32> to vector<1x16xf32>
    %381 = vector.broadcast %380 : vector<1x16xf32> to vector<2x16xf32>
    %382 = arith.addf %378, %381 : vector<2x16xf32>
    %383 = math.tanh %382 : vector<2x16xf32>
    %c3_349 = arith.constant 3 : index
    %c0_350 = arith.constant 0 : index
    %c0_351 = arith.constant 0 : index
    %384 = vector.load %arg1[%c3_349, %c0_350, %c0_351] : memref<4x16x16xf32, #tpu.memory_space<vmem>>, vector<1x16x16xf32>
    %385 = vector.shape_cast %384 : vector<1x16x16xf32> to vector<16x16xf32>
    %cst_352 = arith.constant dense<0.000000e+00> : vector<2x16xf32>
    %386 = tpu.matmul %371, %385, %cst_352 {dimension_numbers = #tpu.dot_dimension_numbers<[1], [0], [0], [1], [0, 0, 1, 1], [], []>} : vector<2x16xf32>, vector<16x16xf32>, vector<2x16xf32> -> vector<2x16xf32>
    %c3_353 = arith.constant 3 : index
    %c0_354 = arith.constant 0 : index
    %c0_355 = arith.constant 0 : index
    %387 = vector.load %arg2[%c3_353, %c0_354, %c0_355] : memref<4x16x16xf32, #tpu.memory_space<vmem>>, vector<1x16x16xf32>
    %388 = vector.shape_cast %387 : vector<1x16x16xf32> to vector<16x16xf32>
    %cst_356 = arith.constant dense<0.000000e+00> : vector<2x16xf32>
    %389 = tpu.matmul %383, %388, %cst_356 {dimension_numbers = #tpu.dot_dimension_numbers<[1], [0], [0], [1], [0, 0, 1, 1], [], []>} : vector<2x16xf32>, vector<16x16xf32>, vector<2x16xf32> -> vector<2x16xf32>
    %390 = arith.addf %386, %389 : vector<2x16xf32>
    %c3_357 = arith.constant 3 : index
    %c0_358 = arith.constant 0 : index
    %c0_359 = arith.constant 0 : index
    %391 = vector.load %arg3[%c3_357, %c0_358, %c0_359] : memref<4x1x16xf32, #tpu.memory_space<vmem>>, vector<1x1x16xf32>
    %392 = vector.shape_cast %391 : vector<1x1x16xf32> to vector<1x16xf32>
    %393 = vector.broadcast %392 : vector<1x16xf32> to vector<2x16xf32>
    %394 = arith.addf %390, %393 : vector<2x16xf32>
    %395 = math.tanh %394 : vector<2x16xf32>
    %396 = tpu.concatenate %127, %176, %225, %274, %323, %359, %383, %395 in 1 : vector<2x16xf32>, vector<2x16xf32>, vector<2x16xf32>, vector<2x16xf32>, vector<2x16xf32>, vector<2x16xf32>, vector<2x16xf32>, vector<2x16xf32> -> vector<2x128xf32>
    %c0_360 = arith.constant 0 : index
    %c0_361 = arith.constant 0 : index
    %397 = vector.load %arg4[%c0_360, %c0_361] : memref<128x64xf32, #tpu.memory_space<vmem>>, vector<128x64xf32>
    %cst_362 = arith.constant dense<0.000000e+00> : vector<2x64xf32>
    %398 = tpu.matmul %396, %397, %cst_362 {dimension_numbers = #tpu.dot_dimension_numbers<[1], [0], [0], [1], [0, 0, 1, 1], [], []>} : vector<2x128xf32>, vector<128x64xf32>, vector<2x64xf32> -> vector<2x64xf32>
    %c0_363 = arith.constant 0 : index
    %c0_364 = arith.constant 0 : index
    %399 = vector.load %arg5[%c0_363, %c0_364] : memref<1x64xf32, #tpu.memory_space<vmem>>, vector<1x64xf32>
    %400 = vector.broadcast %399 : vector<1x64xf32> to vector<2x64xf32>
    %401 = arith.addf %398, %400 : vector<2x64xf32>
    %c0_365 = arith.constant 0 : index
    %c0_366 = arith.constant 0 : index
    %402 = vector.load %arg6[%c0_365, %c0_366] : memref<2x64xf32, #tpu.memory_space<vmem>>, vector<2x64xf32>
    tpu.vector_store %arg6[%c0_365, %c0_366], %401 {strides = array<i32>} : memref<2x64xf32, #tpu.memory_space<vmem>>, vector<2x64xf32>,
    return
  }
}

</mosaic_0001>

<bundles_post_ra>
// kernel: tile.8
= control target key start
LH: loop header
LB: loop body
LE: loop exit
PB: predicated region body
PF: predicated region fallthrough
CT: control target
= control target key end

     0   :  { %s22_s0 = inlined_call_operand.vmem [shape: f32[8], index: 0, kind: input, shape index: {}]   ;;  %s23_s1 = inlined_call_operand.vmem [shape: f32[8,8], index: 1, kind: output, shape index: {}]  }
   0x1   :  { %v4_v0 = vld [vmem:[%s22_s0] ss:$0 sm:$0xff] }
   0x2   :  { %5 = vst [vmem:[%s23_s1] sm:$0xff] %v4_v0 }

// kernel: tile.9
= control target key start
LH: loop header
LB: loop body
LE: loop exit
PB: predicated region body
PF: predicated region fallthrough
CT: control target
= control target key end

     0   :  { %s67_s10 = smov 56   ;;  %s68_s11 = smov 40   ;;  %vm3_vm0 = vcmask 64512   ;;  %vm9_vm1 = vcmask 523712   ;;  %vm15_vm2 = vcmask 458112   ;;  %vm21_vm3 = vcmask 392512   ;;  %s111_s0 = inlined_call_operand.vmem [shape: f32[8,8], index: 0, kind: input, shape index: {}]   ;;  %s112_s1 = inlined_call_operand.vmem [shape: f32[1,64], index: 1, kind: output, shape index: {}]  }
   0x1   :  { %v53_v0 = vld [vmem:[%s111_s0 + $0x7] sm:$0x1]   ;;  %v55_v1 = vld [vmem:[%s111_s0 + $0x5] sm:$0x1]   ;;  %v57_v2 = vld [vmem:[%s111_s0 + $0x3] sm:$0x1]  }
   0x2   :  { %7 = vrot.lane.b32.xlu0 %v53_v0, %s67_s10  ;;  %19 = vrot.lane.b32.xlu1 %v55_v1, %s68_s11  ;;  %s69_s14 = smov 24   ;;  %v54_v3 = vld [vmem:[%s111_s0 + $0x6] sm:$0x1]   ;;  %v56_v4 = vld [vmem:[%s111_s0 + $0x4] sm:$0x1]   ;;  %s70_s21 = smov 48  }
   0x3   :  { %31 = vrot.lane.b32.xlu2 %v57_v2, %s69_s14  ;;  %v58_v5 = vld [vmem:[%s111_s0 + $0x2] sm:$0x1]   ;;  %s71_s22 = smov 32   ;;  %s72_s23 = smov 16   ;;  %v59_v6 = vld [vmem:[%s111_s0 + $0x1] sm:$0x1]  }
   0x4   :  { %s73_s26 = smov 8   ;;  %v2_v7 = vld [vmem:[%s111_s0] sm:$0x1]   ;;  %vm27_vm4 = vcmask 326912   ;;  %vm33_vm5 = vcmask 261312   ;;  %vm39_vm6 = vcmask 195712  }
   0x5   :  { %4 = vst.msk [vmem:[#allocation0] sm:$0x1] %vm3_vm0, %v2_v7   ;;  %vm45_vm7 = vcmask 130112  }
   0xa   :  { %13 = vrot.lane.b32.xlu0 %v54_v3, %s70_s21  ;;  %25 = vrot.lane.b32.xlu1 %v56_v4, %s71_s22 }
   0xb   :  { %37 = vrot.lane.b32.xlu2 %v58_v5, %s72_s23 }
  0x12   :  { %43 = vrot.lane.b32.xlu0 %v59_v6, %s73_s26 }
  0x5d   :  { %v32_v8 = vpop.permute.xlu2 %31  }
  0x65   :  { %v38_v9 = vpop.permute.xlu2 %37  }
  0x74   :  { %v8_v10 = vpop.permute.xlu0 %7   ;;  %v20_v11 = vpop.permute.xlu1 %19  }
  0x75   :  { %10 = vst.msk [vmem:[#allocation0] sm:$0x1] %vm9_vm1, %v8_v10  }
  0x7c   :  { %v14_v12 = vpop.permute.xlu0 %13   ;;  %v26_v13 = vpop.permute.xlu1 %25  }
  0x7d   :  { %16 = vst.msk [vmem:[#allocation0] sm:$0x1] %vm15_vm2, %v14_v12  }
  0x7e   :  { %22 = vst.msk [vmem:[#allocation0] sm:$0x1] %vm21_vm3, %v20_v11  }
  0x7f   :  { %28 = vst.msk [vmem:[#allocation0] sm:$0x1] %vm27_vm4, %v26_v13  }
  0x80   :  { %34 = vst.msk [vmem:[#allocation0] sm:$0x1] %vm33_vm5, %v32_v8  }
  0x81   :  { %40 = vst.msk [vmem:[#allocation0] sm:$0x1] %vm39_vm6, %v38_v9  }
  0x84   :  { %v44_v14 = vpop.permute.xlu0 %43  }
  0x85   :  { %46 = vst.msk [vmem:[#allocation0] sm:$0x1] %vm45_vm7, %v44_v14  }
  0x8c   :  { %v49_v15 = vld [vmem:[#allocation0] sm:$0x1] }
  0x8d   :  { %52 = vst [vmem:[%s112_s1] sm:$0x1] %v49_v15 }

// kernel: rnn_model_forward.1
= control target key start
LH: loop header
LB: loop body
LE: loop exit
PB: predicated region body
PF: predicated region fallthrough
CT: control target
= control target key end

     0   :  { %s1770_s29 = smov 112   ;;  %v1771_v5 = vmov 0.0   ;;  %vm28_vm0 = vcmask 130048   ;;  %s1773_s18 = smov 80   ;;  %vm1560_vm1 = vcmask 261120   ;;  %vm1562_vm2 = vcmask 392192   ;;  %s2223_s2 = inlined_call_operand.vmem [shape: f32[4,16,16], index: 2, kind: input, shape index: {}]   ;;  %s2224_s1 = inlined_call_operand.vmem [shape: f32[4,16,16], index: 1, kind: input, shape index: {}]   ;;  %s2225_s0 = inlined_call_operand.vmem [shape: f32[2,128], index: 0, kind: input, shape index: {}]   ;;  %s2226_s3 = inlined_call_operand.vmem [shape: f32[4,1,16], index: 3, kind: input, shape index: {}]   ;;  %s2227_s4 = inlined_call_operand.vmem [shape: f32[128,64], index: 4, kind: input, shape index: {}]   ;;  %s2228_s5 = inlined_call_operand.vmem [shape: f32[1,64], index: 5, kind: input, shape index: {}]   ;;  %s2229_s6 = inlined_call_operand.vmem [shape: f32[2,64], index: 6, kind: output, shape index: {}]  }
   0x1   :  { %v1816_v0 = vld [vmem:[%s2223_s2 + $0x8] sm:$0xff]  ;;  %v1821_v1 = vld [vmem:[%s2223_s2] sm:$0xff]  ;;  %v1860_v6 = vld [vmem:[%s2224_s1 + $0x18] sm:$0xff]  ;;  %s1774_s30 = smov 64   ;;  %s1775_s15 = smov 48   ;;  %vm1564_vm3 = vcmask 523264  }
   0x2   :  { %46 = vmatpush.msra.mxu1 %v1816_v0  ;;  %v1827_v2 = vld [vmem:[%s2224_s1 + $0x8] sm:$0xff]  ;;  %v1832_v3 = vld [vmem:[%s2225_s0] sm:$0x3]  ;;  %98 = vmatpush.msra.mxu2 %v1816_v0  ;;  %s1772_s0 = smov 96   ;;  %v1865_v7 = vld [vmem:[%s2224_s1 + $0x10] sm:$0xff]  ;;  %s1777_s19 = smov 32  }
   0x3   :  { %104 = vrot.lane.b32.xlu0 %v1832_v3, %s1770_s29  ;;  %122 = vmatpush.msra.mxu3 %v1827_v2  ;;  %v1842_v4 = vld [vmem:[%s2224_s1] sm:$0xff]  ;;  %v1875_v9 = vld [vmem:[%s2223_s2 + $0x18] sm:$0xff]  ;;  %v1880_v10 = vld [vmem:[%s2223_s2 + $0x10] sm:$0xff]  ;;  %vm1566_vm4 = vcmask 654336   ;;  %vm1568_vm5 = vcmask 785408   ;;  %vm1570_vm6 = vcmask 916480  }
   0x4   :  { %47 = vmatpush.msra.mxu1 %v1821_v1  ;;  %99 = vmatpush.msra.mxu2 %v1821_v1  ;;  %v1889_v12 = vld [vmem:[%s2226_s3] ss:$0 sm:$0xff]  ;;  %v1905_v18 = vld [vmem:[%s2223_s2 + $0x28] sm:$0xff]  ;;  %v1932_v26 = vld [vmem:[%s2226_s3 + $0x1] ss:$0 sm:$0xff]  ;;  %vm1612_vm7 = vcmask 517120  }
   0x5   :  { %48 = vmatmul.f32.vlgmr.msra.gmra.mxu1 %v1771_v5  ;;  %123 = vmatpush.msra.mxu3 %v1842_v4  ;;  %v1910_v19 = vld [vmem:[%s2224_s1 + $0x28] sm:$0xff]  ;;  %v1915_v20 = vld [vmem:[%s2223_s2 + $0x20] sm:$0xff]  ;;  %v1954_v34 = vld [vmem:[%s2223_s2 + $0x38] sm:$0xff] }
   0x6   :  { %69 = vmatpush.msrb.mxu1 %v1827_v2  ;;  %347 = vmatpush.msra.mxu0 %v1816_v0  ;;  %v1922_v21 = vld [vmem:[%s2224_s1 + $0x20] sm:$0xff]  ;;  %v1959_v35 = vld [vmem:[%s2224_s1 + $0x38] sm:$0xff]  ;;  %v1964_v36 = vld [vmem:[%s2223_s2 + $0x30] sm:$0xff] }
   0x7   :  { %224 = vmatpush.msrb.mxu3 %v1827_v2  ;;  %150 = vmatpush.msrb.mxu2 %v1875_v9  ;;  %v1971_v37 = vld [vmem:[%s2224_s1 + $0x30] sm:$0xff]  ;;  %v1984_v48 = vld [vmem:[%s2226_s3 + $0x2] ss:$0 sm:$0xff] }
   0x8   :  { %70 = vmatpush.msrb.mxu1 %v1842_v4  ;;  %348 = vmatpush.msra.mxu0 %v1821_v1 }
   0x9   :  { %225 = vmatpush.msrb.mxu3 %v1842_v4  ;;  %151 = vmatpush.msrb.mxu2 %v1880_v10 }
   0xa   :  { %170 = vmatpush.msra.mxu1 %v1860_v6  ;;  %353 = vrot.lane.b32.xlu1 %v1832_v3, %s1773_s18 }
   0xb   :  { %206 = vrot.lane.b32.xlu0 %v1832_v3, %s1772_s0  ;;  %441 = vmatpush.msrb.mxu0 %v1905_v18 }
   0xc   :  { %171 = vmatpush.msra.mxu1 %v1865_v7  ;;  %729 = vrot.lane.b32.xlu2 %v1832_v3, %s1775_s15 }
   0xd   :  { %1618 = vmatmul.msk.f32.vlgmr.msrb.gmra.mxu1 %vm28_vm0, %v1832_v3  ;;  %442 = vmatpush.msrb.mxu0 %v1915_v20 }
   0xe   :  { %269 = vmatpush.msrb.mxu1 %v1860_v6 }
  0x10   :  { %270 = vmatpush.msrb.mxu1 %v1865_v7 }
  0x12   :  { %545 = vrot.lane.b32.xlu1 %v1832_v3, %s1774_s30 }
  0x14   :  { %913 = vrot.lane.b32.xlu2 %v1832_v3, %s1777_s19 }
  0x75   :  { %v105_v8 = vpop.permute.xlu0 %104 }
  0x76   :  { %1620 = vmatmul.msk.f32.vlgmr.msra.gmra.mxu3 %vm28_vm0, %v105_v8 }
  0x77   :  { %249 = vmatpush.msra.mxu3 %v1875_v9 }
  0x79   :  { %250 = vmatpush.msra.mxu3 %v1880_v10 }
  0x7c   :  { %v354_v33 = vpop.permute.xlu1 %353 }
  0x7d   :  { %v207_v17 = vpop.permute.xlu0 %206 }
  0x7e   :  { %1628 = vmatmul.msk.f32.vlgmr.msrb.gmra.mxu3 %vm28_vm0, %v207_v17 }
  0x7f   :  { %317 = vmatpush.msrb.mxu3 %v1910_v19 }
  0x81   :  { %318 = vmatpush.msrb.mxu3 %v1922_v21 }
  0x82   :  { %v49_v11 = vpop.f32.mrf.mxu1 }
  0x84   :  { %v546_v54 = vpop.permute.xlu1 %545 }
  0x8a   :  { %v72_v13 = vpop.f32.mrf.mxu1 }
  0x8b   :  { %v73_v14 = vadd.f32 %v72_v13, %v49_v11 }
  0x8d   :  { %v79_v15 = vadd.f32 %v1889_v12, %v73_v14 }
  0x8f   :  { %1706 = vtanh.f32 %v79_v15  ;;  %v2021_v15 = vld [vmem:[%s2226_s3 + $0x3] ss:$0 sm:$0xff]  ;;  %s1776_s3 = smov 16  }
  0x90   :  { %1097 = vrot.lane.b32.xlu0 %v1832_v3, %s1776_s3 }
  0x95   :  { %v1707_v16 = vpop.eup %1706 }
  0x96   :  { %1619 = vmatmul.msk.f32.vlgmr.msra.gmra.mxu2 %vm28_vm0, %v1707_v16  ;;  %1625 = vmatmul.msk.f32.vlgmr.msra.gmra.mxu1 %vm28_vm0, %v1707_v16 }
  0x97   :  { %200 = vmatpush.msra.mxu2 %v1816_v0  ;;  %371 = vmatpush.msra.mxu1 %v1827_v2 }
  0x99   :  { %201 = vmatpush.msra.mxu2 %v1821_v1  ;;  %372 = vmatpush.msra.mxu1 %v1842_v4 }
  0x9e   :  { %152 = vmatmul.f32.vlgmr.msrb.gmra.mxu2 %v1771_v5 }
  0x9f   :  { %297 = vmatpush.msrb.mxu2 %v1905_v18 }
  0xa1   :  { %298 = vmatpush.msrb.mxu2 %v1915_v20 }
  0xf9   :  { %v125_v22 = vpop.f32.mrf.mxu3 }
 0x101   :  { %v227_v38 = vpop.f32.mrf.mxu3 }
 0x113   :  { %v173_v27 = vpop.f32.mrf.mxu1 }
 0x119   :  { %v101_v23 = vpop.f32.mrf.mxu2 }
 0x11a   :  { %v126_v24 = vadd.f32 %v125_v22, %v101_v23 }
 0x11c   :  { %v128_v25 = vadd.f32 %v1889_v12, %v126_v24 }
 0x11e   :  { %1708 = vtanh.f32 %v128_v25 }
 0x121   :  { %v153_v28 = vpop.f32.mrf.mxu2 }
 0x122   :  { %v174_v29 = vadd.f32 %v173_v27, %v153_v28  ;;  %v730_v27 = vpop.permute.xlu2 %729 }
 0x124   :  { %v1709_v30 = vpop.eup %1708  ;;  %v181_v31 = vadd.f32 %v1932_v26, %v174_v29 }
 0x125   :  { %1627 = vmatmul.msk.f32.vlgmr.msra.gmra.mxu2 %vm28_vm0, %v1709_v30  ;;  %1630 = vmatmul.msk.f32.vlgmr.msrb.gmra.mxu1 %vm28_vm0, %v1709_v30 }
 0x126   :  { %1710 = vtanh.f32 %v181_v31  ;;  %396 = vmatpush.msra.mxu2 %v1875_v9  ;;  %461 = vmatpush.msrb.mxu1 %v1910_v19 }
 0x128   :  { %397 = vmatpush.msra.mxu2 %v1880_v10  ;;  %462 = vmatpush.msrb.mxu1 %v1922_v21 }
 0x12c   :  { %v1711_v32 = vpop.eup %1710 }
 0x12d   :  { %1629 = vmatmul.msk.f32.vlgmr.msra.gmra.mxu3 %vm28_vm0, %v1711_v32  ;;  %299 = vmatmul.f32.vlgmr.msrb.gmra.mxu2 %v1771_v5 }
 0x12e   :  { %416 = vmatpush.msra.mxu3 %v1860_v6  ;;  %1638 = vmatmul.msk.f32.vlgmr.msra.gmra.mxu1 %vm28_vm0, %v354_v33 }
 0x12f   :  { %563 = vmatpush.msra.mxu1 %v1827_v2  ;;  %489 = vmatpush.msrb.mxu2 %v1954_v34 }
 0x130   :  { %417 = vmatpush.msra.mxu3 %v1865_v7 }
 0x131   :  { %564 = vmatpush.msra.mxu1 %v1842_v4  ;;  %490 = vmatpush.msrb.mxu2 %v1964_v36 }
 0x135   :  { %1635 = vmatmul.msk.f32.vlgmr.msrb.gmra.mxu3 %vm28_vm0, %v1711_v32 }
 0x136   :  { %509 = vmatpush.msrb.mxu3 %v1959_v35 }
 0x138   :  { %510 = vmatpush.msrb.mxu3 %v1971_v37 }
 0x1a2   :  { %v272_v42 = vpop.f32.mrf.mxu1 }
 0x1a8   :  { %v203_v39 = vpop.f32.mrf.mxu2 }
 0x1a9   :  { %v228_v40 = vadd.f32 %v227_v38, %v203_v39 }
 0x1ab   :  { %v230_v41 = vadd.f32 %v1889_v12, %v228_v40  ;;  %v374_v55 = vpop.f32.mrf.mxu1 }
 0x1ad   :  { %1712 = vtanh.f32 %v230_v41 }
 0x1b0   :  { %v252_v43 = vpop.f32.mrf.mxu3  ;;  %v300_v47 = vpop.f32.mrf.mxu2 }
 0x1b1   :  { %v273_v44 = vadd.f32 %v272_v42, %v252_v43 }
 0x1b3   :  { %v1713_v45 = vpop.eup %1712  ;;  %v275_v46 = vadd.f32 %v1932_v26, %v273_v44 }
 0x1b4   :  { %1637 = vmatmul.msk.f32.vlgmr.msra.gmra.mxu0 %vm28_vm0, %v1713_v45  ;;  %1640 = vmatmul.msk.f32.vlgmr.msra.gmra.mxu3 %vm28_vm0, %v1713_v45 }
 0x1b5   :  { %1714 = vtanh.f32 %v275_v46  ;;  %539 = vmatpush.msra.mxu0 %v1816_v0  ;;  %608 = vmatpush.msra.mxu3 %v1860_v6 }
 0x1b7   :  { %540 = vmatpush.msra.mxu0 %v1821_v1  ;;  %609 = vmatpush.msra.mxu3 %v1865_v7 }
 0x1b8   :  { %v320_v49 = vpop.f32.mrf.mxu3 }
 0x1b9   :  { %v321_v50 = vadd.f32 %v320_v49, %v300_v47 }
 0x1bb   :  { %v1715_v51 = vpop.eup %1714  ;;  %v328_v52 = vadd.f32 %v1984_v48, %v321_v50 }
 0x1bc   :  { %1639 = vmatmul.msk.f32.vlgmr.msra.gmra.mxu2 %vm28_vm0, %v1715_v51  ;;  %1642 = vmatmul.msk.f32.vlgmr.msrb.gmra.mxu1 %vm28_vm0, %v1715_v51 }
 0x1bd   :  { %1716 = vtanh.f32 %v328_v52  ;;  %588 = vmatpush.msra.mxu2 %v1875_v9  ;;  %653 = vmatpush.msrb.mxu1 %v1910_v19  ;;  %v914_v52 = vpop.permute.xlu2 %913 }
 0x1bf   :  { %589 = vmatpush.msra.mxu2 %v1880_v10  ;;  %654 = vmatpush.msrb.mxu1 %v1922_v21 }
 0x1c3   :  { %v1717_v53 = vpop.eup %1716 }
 0x1c4   :  { %1641 = vmatmul.msk.f32.vlgmr.msrb.gmra.mxu0 %vm28_vm0, %v1717_v53  ;;  %491 = vmatmul.f32.vlgmr.msrb.gmra.mxu2 %v1771_v5 }
 0x1c5   :  { %1647 = vmatmul.msk.f32.vlgmr.msrb.gmra.mxu3 %vm28_vm0, %v1717_v53  ;;  %633 = vmatpush.msrb.mxu0 %v1905_v18 }
 0x1c6   :  { %698 = vmatpush.msrb.mxu3 %v1959_v35  ;;  %678 = vmatpush.msrb.mxu2 %v1954_v34 }
 0x1c7   :  { %634 = vmatpush.msrb.mxu0 %v1915_v20  ;;  %1650 = vmatmul.msk.f32.vlgmr.msra.gmra.mxu1 %vm28_vm0, %v546_v54 }
 0x1c8   :  { %699 = vmatpush.msrb.mxu3 %v1971_v37  ;;  %679 = vmatpush.msrb.mxu2 %v1964_v36 }
 0x1c9   :  { %747 = vmatpush.msra.mxu1 %v1827_v2 }
 0x1cb   :  { %748 = vmatpush.msra.mxu1 %v1842_v4 }
 0x231   :  { %v350_v56 = vpop.f32.mrf.mxu0 }
 0x232   :  { %v375_v57 = vadd.f32 %v374_v55, %v350_v56 }
 0x234   :  { %v377_v58 = vadd.f32 %v1889_v12, %v375_v57 }
 0x236   :  { %1718 = vtanh.f32 %v377_v58 }
 0x237   :  { %v419_v60 = vpop.f32.mrf.mxu3 }
 0x239   :  { %v464_v63 = vpop.f32.mrf.mxu1 }
 0x23c   :  { %v1719_v59 = vpop.eup %1718 }
 0x23d   :  { %1649 = vmatmul.msk.f32.vlgmr.msra.gmra.mxu0 %vm28_vm0, %v1719_v59  ;;  %1652 = vmatmul.msk.f32.vlgmr.msra.gmra.mxu3 %vm28_vm0, %v1719_v59 }
 0x23e   :  { %723 = vmatpush.msra.mxu0 %v1816_v0  ;;  %792 = vmatpush.msra.mxu3 %v1860_v6 }
 0x23f   :  { %v399_v61 = vpop.f32.mrf.mxu2 }
 0x240   :  { %v420_v62 = vadd.f32 %v419_v60, %v399_v61  ;;  %724 = vmatpush.msra.mxu0 %v1821_v1  ;;  %793 = vmatpush.msra.mxu3 %v1865_v7 }
 0x241   :  { %v444_v5 = vpop.f32.mrf.mxu0 }
 0x242   :  { %v422_v8 = vadd.f32 %v1932_v26, %v420_v62  ;;  %v465_v11 = vadd.f32 %v464_v63, %v444_v5 }
 0x244   :  { %1720 = vtanh.f32 %v422_v8  ;;  %v467_v13 = vadd.f32 %v1984_v48, %v465_v11  ;;  %v566_v28 = vpop.f32.mrf.mxu1 }
 0x246   :  { %1722 = vtanh.f32 %v467_v13 }
 0x247   :  { %v492_v14 = vpop.f32.mrf.mxu2 }
 0x248   :  { %v512_v16 = vpop.f32.mrf.mxu3 }
 0x249   :  { %v513_v17 = vadd.f32 %v512_v16, %v492_v14  ;;  %v1098_v16 = vpop.permute.xlu0 %1097 }
 0x24a   :  { %v1721_v22 = vpop.eup %1720 }
 0x24b   :  { %v520_v23 = vadd.f32 %v2021_v15, %v513_v17  ;;  %1651 = vmatmul.msk.f32.vlgmr.msra.gmra.mxu2 %vm28_vm0, %v1721_v22  ;;  %1654 = vmatmul.msk.f32.vlgmr.msrb.gmra.mxu1 %vm28_vm0, %v1721_v22 }
 0x24c   :  { %v1723_v24 = vpop.eup %1722  ;;  %772 = vmatpush.msra.mxu2 %v1875_v9  ;;  %837 = vmatpush.msrb.mxu1 %v1910_v19 }
 0x24d   :  { %1724 = vtanh.f32 %v520_v23  ;;  %1653 = vmatmul.msk.f32.vlgmr.msrb.gmra.mxu0 %vm28_vm0, %v1723_v24  ;;  %1656 = vmatmul.msk.f32.vlgmr.msrb.gmra.mxu3 %vm28_vm0, %v1723_v24 }
 0x24e   :  { %817 = vmatpush.msrb.mxu0 %v1905_v18  ;;  %882 = vmatpush.msrb.mxu3 %v1959_v35 }
 0x24f   :  { %773 = vmatpush.msra.mxu2 %v1880_v10  ;;  %838 = vmatpush.msrb.mxu1 %v1922_v21 }
 0x250   :  { %818 = vmatpush.msrb.mxu0 %v1915_v20  ;;  %883 = vmatpush.msrb.mxu3 %v1971_v37 }
 0x253   :  { %v2036_v25 = vpop.eup %1724  ;;  %1658 = vmatmul.msk.f32.vlgmr.msra.gmra.mxu1 %vm28_vm0, %v730_v27 }
 0x254   :  { %1655 = vmatmul.msk.f32.vlgmr.msrb.gmra.mxu2 %vm28_vm0, %v2036_v25  ;;  %931 = vmatpush.msra.mxu1 %v1827_v2 }
 0x255   :  { %862 = vmatpush.msrb.mxu2 %v1954_v34 }
 0x256   :  { %932 = vmatpush.msra.mxu1 %v1842_v4 }
 0x257   :  { %863 = vmatpush.msrb.mxu2 %v1964_v36 }
 0x2ba   :  { %v542_v29 = vpop.f32.mrf.mxu0 }
 0x2bb   :  { %v567_v30 = vadd.f32 %v566_v28, %v542_v29 }
 0x2bd   :  { %v569_v31 = vadd.f32 %v1889_v12, %v567_v30 }
 0x2bf   :  { %1726 = vtanh.f32 %v569_v31 }
 0x2c0   :  { %v611_v40 = vpop.f32.mrf.mxu3 }
 0x2c5   :  { %v1727_v32 = vpop.eup %1726 }
 0x2c6   :  { %1657 = vmatmul.msk.f32.vlgmr.msra.gmra.mxu0 %vm28_vm0, %v1727_v32  ;;  %1660 = vmatmul.msk.f32.vlgmr.msra.gmra.mxu3 %vm28_vm0, %v1727_v32 }
 0x2c7   :  { %907 = vmatpush.msra.mxu0 %v1816_v0  ;;  %976 = vmatpush.msra.mxu3 %v1860_v6 }
 0x2c8   :  { %v656_v3 = vpop.f32.mrf.mxu1 }
 0x2c9   :  { %908 = vmatpush.msra.mxu0 %v1821_v1  ;;  %977 = vmatpush.msra.mxu3 %v1865_v7 }
 0x2ca   :  { %v636_v33 = vpop.f32.mrf.mxu0 }
 0x2cb   :  { %v657_v38 = vadd.f32 %v656_v3, %v636_v33 }
 0x2cd   :  { %v659_v39 = vadd.f32 %v1984_v48, %v657_v38 }
 0x2ce   :  { %v591_v41 = vpop.f32.mrf.mxu2 }
 0x2cf   :  { %1728 = vtanh.f32 %v659_v39  ;;  %v612_v42 = vadd.f32 %v611_v40, %v591_v41 }
 0x2d0   :  { %v701_v45 = vpop.f32.mrf.mxu3  ;;  %v750_v53 = vpop.f32.mrf.mxu1 }
 0x2d1   :  { %v614_v43 = vadd.f32 %v1932_v26, %v612_v42 }
 0x2d3   :  { %1730 = vtanh.f32 %v614_v43 }
 0x2d5   :  { %v1729_v44 = vpop.eup %1728 }
 0x2d6   :  { %1661 = vmatmul.msk.f32.vlgmr.msrb.gmra.mxu0 %vm28_vm0, %v1729_v44  ;;  %1664 = vmatmul.msk.f32.vlgmr.msrb.gmra.mxu3 %vm28_vm0, %v1729_v44 }
 0x2d7   :  { %v681_v46 = vpop.f32.mrf.mxu2  ;;  %1001 = vmatpush.msrb.mxu0 %v1905_v18  ;;  %1066 = vmatpush.msrb.mxu3 %v1959_v35 }
 0x2d8   :  { %v702_v47 = vadd.f32 %v701_v45, %v681_v46 }
 0x2d9   :  { %v1731_v49 = vpop.eup %1730  ;;  %1002 = vmatpush.msrb.mxu0 %v1915_v20  ;;  %1067 = vmatpush.msrb.mxu3 %v1971_v37 }
 0x2da   :  { %v704_v50 = vadd.f32 %v2021_v15, %v702_v47  ;;  %1659 = vmatmul.msk.f32.vlgmr.msra.gmra.mxu2 %vm28_vm0, %v1731_v49  ;;  %1662 = vmatmul.msk.f32.vlgmr.msrb.gmra.mxu1 %vm28_vm0, %v1731_v49 }
 0x2db   :  { %956 = vmatpush.msra.mxu2 %v1875_v9  ;;  %1021 = vmatpush.msrb.mxu1 %v1910_v19 }
 0x2dc   :  { %1732 = vtanh.f32 %v704_v50 }
 0x2dd   :  { %957 = vmatpush.msra.mxu2 %v1880_v10  ;;  %1022 = vmatpush.msrb.mxu1 %v1922_v21 }
 0x2e2   :  { %v1733_v51 = vpop.eup %1732  ;;  %1666 = vmatmul.msk.f32.vlgmr.msra.gmra.mxu1 %vm28_vm0, %v914_v52 }
 0x2e3   :  { %1537 = vrot.lane.b32.xlu1 %v1733_v51, %s1776_s3  ;;  %1663 = vmatmul.msk.f32.vlgmr.msrb.gmra.mxu2 %vm28_vm0, %v1733_v51 }
 0x2e4   :  { %1046 = vmatpush.msrb.mxu2 %v1954_v34  ;;  %1115 = vmatpush.msra.mxu1 %v1827_v2 }
 0x2e6   :  { %1047 = vmatpush.msrb.mxu2 %v1964_v36  ;;  %1116 = vmatpush.msra.mxu1 %v1842_v4 }
 0x343   :  { %v726_v54 = vpop.f32.mrf.mxu0 }
 0x344   :  { %v751_v55 = vadd.f32 %v750_v53, %v726_v54 }
 0x346   :  { %v753_v56 = vadd.f32 %v1889_v12, %v751_v55 }
 0x348   :  { %1734 = vtanh.f32 %v753_v56 }
 0x349   :  { %v795_v60 = vpop.f32.mrf.mxu3 }
 0x34e   :  { %v1735_v57 = vpop.eup %1734 }
 0x34f   :  { %1665 = vmatmul.msk.f32.vlgmr.msra.gmra.mxu0 %vm28_vm0, %v1735_v57  ;;  %1668 = vmatmul.msk.f32.vlgmr.msra.gmra.mxu3 %vm28_vm0, %v1735_v57 }
 0x350   :  { %1091 = vmatpush.msra.mxu0 %v1816_v0  ;;  %1160 = vmatpush.msra.mxu3 %v1860_v6 }
 0x352   :  { %1092 = vmatpush.msra.mxu0 %v1821_v1  ;;  %1161 = vmatpush.msra.mxu3 %v1865_v7 }
 0x353   :  { %v820_v2 = vpop.f32.mrf.mxu0 }
 0x357   :  { %v840_v4 = vpop.f32.mrf.mxu1 }
 0x358   :  { %v841_v58 = vadd.f32 %v840_v4, %v820_v2 }
 0x359   :  { %v885_v0 = vpop.f32.mrf.mxu3 }
 0x35a   :  { %v843_v59 = vadd.f32 %v1984_v48, %v841_v58 }
 0x35c   :  { %1736 = vtanh.f32 %v843_v59 }
 0x35d   :  { %v775_v61 = vpop.f32.mrf.mxu2 }
 0x35e   :  { %v796_v62 = vadd.f32 %v795_v60, %v775_v61 }
 0x35f   :  { %v934_v17 = vpop.f32.mrf.mxu1 }
 0x360   :  { %v798_v63 = vadd.f32 %v1932_v26, %v796_v62 }
 0x362   :  { %v1737_v5 = vpop.eup %1736  ;;  %1738 = vtanh.f32 %v798_v63 }
 0x363   :  { %1669 = vmatmul.msk.f32.vlgmr.msrb.gmra.mxu0 %vm28_vm0, %v1737_v5  ;;  %1672 = vmatmul.msk.f32.vlgmr.msrb.gmra.mxu3 %vm28_vm0, %v1737_v5 }
 0x364   :  { %1185 = vmatpush.msrb.mxu0 %v1905_v18  ;;  %1250 = vmatpush.msrb.mxu3 %v1959_v35 }
 0x366   :  { %v865_v1 = vpop.f32.mrf.mxu2  ;;  %1186 = vmatpush.msrb.mxu0 %v1915_v20  ;;  %1251 = vmatpush.msrb.mxu3 %v1971_v37 }
 0x367   :  { %v886_v8 = vadd.f32 %v885_v0, %v865_v1 }
 0x368   :  { %v1739_v11 = vpop.eup %1738 }
 0x369   :  { %v888_v13 = vadd.f32 %v2021_v15, %v886_v8  ;;  %1667 = vmatmul.msk.f32.vlgmr.msra.gmra.mxu2 %vm28_vm0, %v1739_v11  ;;  %1670 = vmatmul.msk.f32.vlgmr.msrb.gmra.mxu1 %vm28_vm0, %v1739_v11 }
 0x36a   :  { %1140 = vmatpush.msra.mxu2 %v1875_v9  ;;  %1205 = vmatpush.msrb.mxu1 %v1910_v19 }
 0x36b   :  { %1740 = vtanh.f32 %v888_v13 }
 0x36c   :  { %1141 = vmatpush.msra.mxu2 %v1880_v10  ;;  %1206 = vmatpush.msrb.mxu1 %v1922_v21 }
 0x371   :  { %v1741_v14 = vpop.eup %1740  ;;  %1674 = vmatmul.msk.f32.vlgmr.msra.gmra.mxu1 %vm28_vm0, %v1098_v16 }
 0x372   :  { %1540 = vrot.lane.b32.xlu2 %v1741_v14, %s1777_s19  ;;  %1671 = vmatmul.msk.f32.vlgmr.msrb.gmra.mxu2 %vm28_vm0, %v1741_v14 }
 0x373   :  { %1230 = vmatpush.msrb.mxu2 %v1954_v34  ;;  %1298 = vmatpush.msra.mxu1 %v1860_v6 }
 0x375   :  { %1231 = vmatpush.msrb.mxu2 %v1964_v36  ;;  %1299 = vmatpush.msra.mxu1 %v1865_v7 }
 0x3cc   :  { %v910_v22 = vpop.f32.mrf.mxu0 }
 0x3cd   :  { %v935_v23 = vadd.f32 %v934_v17, %v910_v22 }
 0x3cf   :  { %v937_v24 = vadd.f32 %v1889_v12, %v935_v23 }
 0x3d1   :  { %1742 = vtanh.f32 %v937_v24 }
 0x3d2   :  { %v979_v30 = vpop.f32.mrf.mxu3 }
 0x3d7   :  { %v1743_v27 = vpop.eup %1742 }
 0x3d8   :  { %1673 = vmatmul.msk.f32.vlgmr.msra.gmra.mxu0 %vm28_vm0, %v1743_v27  ;;  %1676 = vmatmul.msk.f32.vlgmr.msra.gmra.mxu3 %vm28_vm0, %v1743_v27  ;;  %v1587_v27 = vld [vmem:[%s2227_s4 + $0x78] sm:$0xff] }
 0x3d9   :  { %1343 = vmatpush.msra.mxu3 %v1910_v19  ;;  %1275 = vmatpush.msra.mxu0 %v1875_v9 }
 0x3db   :  { %1344 = vmatpush.msra.mxu3 %v1922_v21  ;;  %1276 = vmatpush.msra.mxu0 %v1880_v10 }
 0x3e0   :  { %v1004_v6 = vpop.f32.mrf.mxu0 }
 0x3e6   :  { %v1024_v7 = vpop.f32.mrf.mxu1  ;;  %v1069_v9 = vpop.f32.mrf.mxu3 }
 0x3e7   :  { %v1025_v28 = vadd.f32 %v1024_v7, %v1004_v6  ;;  %v1586_v6 = vld [vmem:[%s2227_s4 + $0x70] sm:$0xff]  ;;  %v1584_v7 = vld [vmem:[%s2227_s4 + $0x60] sm:$0xff] }
 0x3e9   :  { %v1027_v29 = vadd.f32 %v1984_v48, %v1025_v28  ;;  %v1583_v28 = vld [vmem:[%s2227_s4 + $0x58] sm:$0xff] }
 0x3eb   :  { %1744 = vtanh.f32 %v1027_v29  ;;  %v1582_v29 = vld [vmem:[%s2227_s4 + $0x50] sm:$0xff] }
 0x3ec   :  { %v959_v31 = vpop.f32.mrf.mxu2 }
 0x3ed   :  { %v980_v32 = vadd.f32 %v979_v30, %v959_v31  ;;  %v1581_v30 = vld [vmem:[%s2227_s4 + $0x48] sm:$0xff]  ;;  %v1580_v31 = vld [vmem:[%s2227_s4 + $0x40] sm:$0xff] }
 0x3ef   :  { %v982_v3 = vadd.f32 %v1932_v26, %v980_v32  ;;  %v1579_v32 = vld [vmem:[%s2227_s4 + $0x38] sm:$0xff] }
 0x3f1   :  { %v1745_v33 = vpop.eup %1744  ;;  %1746 = vtanh.f32 %v982_v3  ;;  %v1578_v3 = vld [vmem:[%s2227_s4 + $0x30] sm:$0xff] }
 0x3f2   :  { %1677 = vmatmul.msk.f32.vlgmr.msrb.gmra.mxu0 %vm28_vm0, %v1745_v33  ;;  %1680 = vmatmul.msk.f32.vlgmr.msrb.gmra.mxu3 %vm28_vm0, %v1745_v33  ;;  %v1577_v33 = vld [vmem:[%s2227_s4 + $0x28] sm:$0xff] }
 0x3f3   :  { %1368 = vmatpush.msrb.mxu0 %v1954_v34  ;;  %1436 = vmatpush.msrb.mxu3 %v1910_v19 }
 0x3f5   :  { %v1049_v10 = vpop.f32.mrf.mxu2  ;;  %1369 = vmatpush.msrb.mxu0 %v1964_v36  ;;  %1437 = vmatpush.msrb.mxu3 %v1922_v21  ;;  %v1118_v21 = vpop.f32.mrf.mxu1 }
 0x3f6   :  { %v1070_v38 = vadd.f32 %v1069_v9, %v1049_v10 }
 0x3f7   :  { %v1747_v39 = vpop.eup %1746 }
 0x3f8   :  { %v1072_v40 = vadd.f32 %v2021_v15, %v1070_v38  ;;  %1675 = vmatmul.msk.f32.vlgmr.msra.gmra.mxu2 %vm28_vm0, %v1747_v39  ;;  %1678 = vmatmul.msk.f32.vlgmr.msrb.gmra.mxu1 %vm28_vm0, %v1747_v39  ;;  %v1576_v38 = vld [vmem:[%s2227_s4 + $0x20] sm:$0xff] }
 0x3f9   :  { %1323 = vmatpush.msra.mxu2 %v1905_v18  ;;  %1388 = vmatpush.msrb.mxu1 %v1959_v35 }
 0x3fa   :  { %1748 = vtanh.f32 %v1072_v40  ;;  %v1575_v40 = vld [vmem:[%s2227_s4 + $0x18] sm:$0xff] }
 0x3fb   :  { %1324 = vmatpush.msra.mxu2 %v1915_v20  ;;  %1389 = vmatpush.msrb.mxu1 %v1971_v37 }
 0x400   :  { %v1749_v19 = vpop.eup %1748 }
 0x401   :  { %1543 = vrot.lane.b32.xlu0 %v1749_v19, %s1775_s15  ;;  %1679 = vmatmul.msk.f32.vlgmr.msrb.gmra.mxu2 %vm28_vm0, %v1749_v19 }
 0x402   :  { %1413 = vmatpush.msrb.mxu2 %v1905_v18 }
 0x404   :  { %1414 = vmatpush.msrb.mxu2 %v1915_v20 }
 0x455   :  { %v1094_v41 = vpop.f32.mrf.mxu0 }
 0x456   :  { %v1119_v42 = vadd.f32 %v1118_v21, %v1094_v41  ;;  %v1574_v21 = vld [vmem:[%s2227_s4 + $0x10] sm:$0xff]  ;;  %v1573_v41 = vld [vmem:[%s2227_s4 + $0x8] sm:$0xff] }
 0x458   :  { %v1121_v43 = vadd.f32 %v1889_v12, %v1119_v42 }
 0x45a   :  { %1750 = vtanh.f32 %v1121_v43  ;;  %v1538_v43 = vpop.permute.xlu1 %1537 }
 0x45b   :  { %v1163_v20 = vpop.f32.mrf.mxu3 }
 0x460   :  { %v1751_v44 = vpop.eup %1750 }
 0x461   :  { %1682 = vmatmul.msk.f32.vlgmr.msra.gmra.mxu1 %vm28_vm0, %v1751_v44  ;;  %v1541_v44 = vpop.permute.xlu2 %1540 }
 0x462   :  { %1481 = vmatpush.msra.mxu1 %v1959_v35 }
 0x464   :  { %1482 = vmatpush.msra.mxu1 %v1971_v37 }
 0x46f   :  { %v1188_v45 = vpop.f32.mrf.mxu0 }
 0x475   :  { %v1208_v46 = vpop.f32.mrf.mxu1  ;;  %v1253_v52 = vpop.f32.mrf.mxu3 }
 0x476   :  { %v1209_v47 = vadd.f32 %v1208_v46, %v1188_v45  ;;  %v1544_v45 = vpop.permute.xlu0 %1543 }
 0x478   :  { %v1211_v18 = vadd.f32 %v1984_v48, %v1209_v47  ;;  %v1559_v47 = vsel %vm28_vm0, %v2036_v25, %v1538_v43 }
 0x47a   :  { %1752 = vtanh.f32 %v1211_v18  ;;  %v1561_v18 = vsel %vm1560_vm1, %v1559_v47, %v1541_v44 }
 0x47b   :  { %v1143_v49 = vpop.f32.mrf.mxu2 }
 0x47c   :  { %v1164_v50 = vadd.f32 %v1163_v20, %v1143_v49  ;;  %v1563_v49 = vsel %vm1562_vm2, %v1561_v18, %v1544_v45 }
 0x47e   :  { %v1166_v51 = vadd.f32 %v1932_v26, %v1164_v50 }
 0x480   :  { %v1753_v12 = vpop.eup %1752  ;;  %1754 = vtanh.f32 %v1166_v51 }
 0x481   :  { %1683 = vmatmul.msk.f32.vlgmr.msra.gmra.mxu2 %vm28_vm0, %v1753_v12  ;;  %1686 = vmatmul.msk.f32.vlgmr.msrb.gmra.mxu1 %vm28_vm0, %v1753_v12 }
 0x482   :  { %1506 = vmatpush.msra.mxu2 %v1954_v34 }
 0x484   :  { %v1233_v53 = vpop.f32.mrf.mxu2  ;;  %1507 = vmatpush.msra.mxu2 %v1964_v36 }
 0x485   :  { %v1254_v54 = vadd.f32 %v1253_v52, %v1233_v53 }
 0x486   :  { %v1755_v55 = vpop.eup %1754 }
 0x487   :  { %v1256_v56 = vadd.f32 %v2021_v15, %v1254_v54  ;;  %1681 = vmatmul.msk.f32.vlgmr.msra.gmra.mxu0 %vm28_vm0, %v1755_v55  ;;  %1684 = vmatmul.msk.f32.vlgmr.msra.gmra.mxu3 %vm28_vm0, %v1755_v55  ;;  %v1705_v55 = vld [vmem:[%s2228_s5] ss:$0 sm:$0xff] }
 0x488   :  { %1461 = vmatpush.msra.mxu0 %v1954_v34  ;;  %1529 = vmatpush.msra.mxu3 %v1959_v35 }
 0x489   :  { %1756 = vtanh.f32 %v1256_v56 }
 0x48a   :  { %1462 = vmatpush.msra.mxu0 %v1964_v36  ;;  %1530 = vmatpush.msra.mxu3 %v1971_v37 }
 0x48f   :  { %v1757_v57 = vpop.eup %1756 }
 0x490   :  { %1546 = vrot.lane.b32.xlu1 %v1757_v57, %s1774_s30  ;;  %1685 = vmatmul.msk.f32.vlgmr.msrb.gmra.mxu0 %vm28_vm0, %v1757_v57 }
 0x491   :  { %1592 = vmatpush.msrb.mxu0 %v1587_v27 }
 0x493   :  { %1593 = vmatpush.msrb.mxu0 %v1586_v6 }
 0x4de   :  { %v1301_v2 = vpop.f32.mrf.mxu1 }
 0x4fe   :  { %v1391_v35 = vpop.f32.mrf.mxu1 }
 0x502   :  { %v1547_v46 = vpop.permute.xlu1 %1546 }
 0x503   :  { %v1565_v51 = vsel %vm1564_vm3, %v1563_v49, %v1547_v46 }
 0x504   :  { %v1278_v4 = vpop.f32.mrf.mxu0  ;;  %v1326_v60 = vpop.f32.mrf.mxu2 }
 0x505   :  { %v1302_v58 = vadd.f32 %v1301_v2, %v1278_v4 }
 0x507   :  { %v1304_v59 = vadd.f32 %v1932_v26, %v1302_v58 }
 0x509   :  { %1758 = vtanh.f32 %v1304_v59 }
 0x50a   :  { %v1346_v34 = vpop.f32.mrf.mxu3 }
 0x50b   :  { %v1347_v61 = vadd.f32 %v1346_v34, %v1326_v60 }
 0x50d   :  { %v1349_v62 = vadd.f32 %v1984_v48, %v1347_v61  ;;  %v1371_v36 = vpop.f32.mrf.mxu0 }
 0x50e   :  { %v1392_v63 = vadd.f32 %v1391_v35, %v1371_v36 }
 0x50f   :  { %v1759_v37 = vpop.eup %1758  ;;  %1760 = vtanh.f32 %v1349_v62 }
 0x510   :  { %v1394_v5 = vadd.f32 %v2021_v15, %v1392_v63  ;;  %1688 = vmatmul.msk.f32.vlgmr.msrb.gmra.mxu3 %vm28_vm0, %v1759_v37 }
 0x512   :  { %1762 = vtanh.f32 %v1394_v5 }
 0x515   :  { %v1761_v0 = vpop.eup %1760 }
 0x516   :  { %1687 = vmatmul.msk.f32.vlgmr.msrb.gmra.mxu2 %vm28_vm0, %v1761_v0  ;;  %1690 = vmatmul.msk.f32.vlgmr.msra.gmra.mxu1 %vm28_vm0, %v1761_v0 }
 0x518   :  { %v1763_v26 = vpop.eup %1762 }
 0x519   :  { %1549 = vrot.lane.b32.xlu2 %v1763_v26, %s1773_s18  ;;  %1689 = vmatmul.msk.f32.vlgmr.msra.gmra.mxu0 %vm28_vm0, %v1763_v26 }
 0x573   :  { %v1550_v20 = vpop.permute.xlu2 %1549 }
 0x574   :  { %v1567_v12 = vsel %vm1566_vm4, %v1565_v51, %v1550_v20 }
 0x593   :  { %v1484_v1 = vpop.f32.mrf.mxu1  ;;  %v1439_v13 = vpop.f32.mrf.mxu3 }
 0x596   :  { %v1464_v8 = vpop.f32.mrf.mxu0 }
 0x597   :  { %v1485_v11 = vadd.f32 %v1484_v1, %v1464_v8 }
 0x599   :  { %v1487_v14 = vadd.f32 %v2021_v15, %v1485_v11  ;;  %v1416_v16 = vpop.f32.mrf.mxu2 }
 0x59a   :  { %v1440_v17 = vadd.f32 %v1439_v13, %v1416_v16 }
 0x59b   :  { %1764 = vtanh.f32 %v1487_v14 }
 0x59c   :  { %v1442_v22 = vadd.f32 %v1984_v48, %v1440_v17  ;;  %v1585_v48 = vld [vmem:[%s2227_s4 + $0x68] sm:$0xff] }
 0x59d   :  { %1594 = vmatpush.msrb.mxu0 %v1585_v48 }
 0x59e   :  { %1766 = vtanh.f32 %v1442_v22 }
 0x59f   :  { %1595 = vmatpush.msrb.mxu0 %v1584_v7 }
 0x5a1   :  { %v1765_v23 = vpop.eup %1764  ;;  %1596 = vmatpush.msrb.mxu0 %v1583_v28 }
 0x5a2   :  { %1552 = vrot.lane.b32.xlu0 %v1765_v23, %s1772_s0  ;;  %1691 = vmatmul.msk.f32.vlgmr.msra.gmra.mxu2 %vm28_vm0, %v1765_v23 }
 0x5a3   :  { %1597 = vmatpush.msrb.mxu0 %v1582_v29 }
 0x5a4   :  { %v1767_v24 = vpop.eup %1766 }
 0x5a5   :  { %1692 = vmatmul.msk.f32.vlgmr.msra.gmra.mxu3 %vm28_vm0, %v1767_v24  ;;  %1598 = vmatpush.msrb.mxu0 %v1581_v30 }
 0x5a7   :  { %1599 = vmatpush.msrb.mxu0 %v1580_v31 }
 0x5a9   :  { %1600 = vmatpush.msrb.mxu0 %v1579_v32 }
 0x5ab   :  { %1601 = vmatpush.msrb.mxu0 %v1578_v3 }
 0x5ad   :  { %1602 = vmatpush.msrb.mxu0 %v1577_v33 }
 0x5af   :  { %1603 = vmatpush.msrb.mxu0 %v1576_v38 }
 0x5b1   :  { %1604 = vmatpush.msrb.mxu0 %v1575_v40 }
 0x5b3   :  { %1605 = vmatpush.msrb.mxu0 %v1574_v21 }
 0x5b5   :  { %1606 = vmatpush.msrb.mxu0 %v1573_v41 }
 0x614   :  { %v1553_v50 = vpop.permute.xlu0 %1552 }
 0x615   :  { %v1569_v52 = vsel %vm1568_vm5, %v1567_v12, %v1553_v50 }
 0x625   :  { %v1509_v9 = vpop.f32.mrf.mxu2 }
 0x628   :  { %v1532_v10 = vpop.f32.mrf.mxu3 }
 0x629   :  { %v1533_v39 = vadd.f32 %v1532_v10, %v1509_v9 }
 0x62b   :  { %v1535_v19 = vadd.f32 %v2021_v15, %v1533_v39  ;;  %v1572_v15 = vld [vmem:[%s2227_s4] sm:$0xff] }
 0x62c   :  { %1607 = vmatpush.msrb.mxu0 %v1572_v15 }
 0x62d   :  { %1768 = vtanh.f32 %v1535_v19 }
 0x633   :  { %v1769_v42 = vpop.eup %1768 }
 0x634   :  { %1556 = vrot.lane.b32.xlu1 %v1769_v42, %s1770_s29 }
 0x6a6   :  { %v1557_v53 = vpop.permute.xlu1 %1556 }
 0x6a7   :  { %v1571_v54 = vsel %vm1570_vm6, %v1569_v52, %v1557_v53 }
 0x6a8   :  { %1608 = vmatmul.f32.vlgmr.msrb.gmra.mxu0 %v1571_v54 }
 0x725   :  { %v1609_v56 = vpop.f32.mrf.mxu0 }
 0x726   :  { %v1610_v25 = vadd.f32 %v1705_v55, %v1609_v56 }
 0x728   :  { %1613 = vst.msk [vmem:[%s2229_s6] sm:$0x3] %vm1612_vm7, %v1610_v25 }

</bundles_post_ra>
